<compile_context>
chip_gen: v7x
topology: tpu7x:2x2x1
jax: 0.10.0
libtpu: 0.0.40
codegen_flags: <defaults>
</compile_context>

<pallas_src>
import functools
import math

import jax
import jax.numpy as jnp
from jax.experimental import pallas as pl
from jax.experimental.pallas import tpu as pltpu

# (in_features, out_features) per layer, matching the PyTorch __init__
LAYER_DIMS = [
    (4 * 30, 120),
    (120, 120),
    (120, 120),
    (120, 120),
    (120, 120),
    (120, 60),
    (60, 60),
    (60, 45),
    (45, 30),
    (30, 15),
    (15, 10),
    (10, 1),
]
N_LAYERS = len(LAYER_DIMS)
PAD = 128  # every layer's in/out dim zero-padded to 128 lanes
F_IN = LAYER_DIMS[0][0]  # 120


def _round_up(n, m):
    return ((n + m - 1) // m) * m


def mlp_kernel(x_ref, w_ref, b_ref, o_ref):
    """x_ref: (bb, 120) f32; w_ref: (128, 12*128) f32/bf16; b_ref: (1, 12*128) f32;
    o_ref: (bb//128, 128) f32 — row g holds the outputs of batch rows g*128..g*128+127."""
    h = x_ref[...].astype(jnp.float32)                     # (bb, 120)
    for i in range(N_LAYERS):
        din = F_IN if i == 0 else PAD                      # 120 rows for layer 0, else 128
        w = w_ref[:din, i * PAD:(i + 1) * PAD]             # static, sublane-aligned slice
        b = b_ref[:, i * PAD:(i + 1) * PAD]                # (1, 128) f32
        h = jnp.dot(h.astype(w_ref.dtype), w,
                    preferred_element_type=jnp.float32) + b
        if i < N_LAYERS - 1:
            h = jnp.maximum(h, 0.0)                        # F.relu in f32
    # h: (bb, 128); only column 0 is the real output.  Transpose each 128x128
    # granule (XLU vxpose — otherwise-idle slot) so batch rows land on lanes,
    # then keep only the real values -> lane-dense unmasked store, ~128x less
    # output HBM traffic than a padded (bb, 128) slab.
    bb = h.shape[0]
    rows = []
    for g in range(bb // 128):
        blk_t = jnp.transpose(h[g * 128:(g + 1) * 128, :])  # (128, 128)
        rows.append(blk_t[0:1, :])                           # (1, 128)
    o_ref[...] = jnp.concatenate(rows, axis=0).astype(o_ref.dtype)


@functools.partial(jax.jit, static_argnames=("block_b",))
def mlp_forward(x, w_packed, b_packed, *, block_b=2048):
    """x: (B, 120) (any float dtype). w_packed: (128, 12*128) f32/bf16.
    b_packed: (1, 12*128) f32. Returns (B, 1) f32."""
    B, f_in = x.shape
    assert f_in == F_IN, "expected 4*30=120 input features"
    assert block_b % 1024 == 0 and block_b >= 1024, "block_b must be a multiple of 1024"

    G = pl.cdiv(B, 128)            # number of 128-row output granules
    total = G * 128                # batch rounded up to a granule
    bb = min(block_b, total)       # batch tile (multiple of 128)
    # v7x megacore: keep >= 2 grid steps when there is enough work for two cores.
    if bb == total and total >= 2048:
        bb = _round_up(total // 2, 1024)
    nblk = bb // 128               # output granules per grid step
    grid = pl.cdiv(G, nblk)        # last tile may be partial (OOB reads/writes masked)

    out = pl.pallas_call(
        mlp_kernel,
        out_shape=jax.ShapeDtypeStruct((G, 128), jnp.float32),
        grid_spec=pl.GridSpec(
            grid=(grid,),
            in_specs=[
                # x passed unpadded: last block dim == full array dim (120) is legal.
                pl.BlockSpec((bb, F_IN), lambda i: (i, 0)),
                # packed weights / biases: constant index_map -> fetched once.
                pl.BlockSpec((PAD, N_LAYERS * PAD), lambda i: (0, 0)),
                pl.BlockSpec((1, N_LAYERS * PAD), lambda i: (0, 0)),
            ],
            out_specs=pl.BlockSpec((nblk, 128), lambda i: (i, 0)),
        ),
        compiler_params=pltpu.CompilerParams(
            dimension_semantics=("parallel",),      # shard batch axis across TCs (v7x)
            vmem_limit_bytes=32 * 1024 * 1024,      # covers v5e's 16 MiB default; fits v7x
        ),
    )(x.astype(jnp.float32), w_packed, b_packed)

    # Tiny lane-dense result: (G, 128) -> (B, 1).  Rows beyond B (pad granule /
    # OOB garbage rows) are sliced off here.
    return out.reshape(-1)[:B].reshape(B, 1)


def init_params(key):
    """PyTorch nn.Linear-style init (uniform(-1/sqrt(fan_in), 1/sqrt(fan_in))).
    Weights returned already transposed to (in, out); biases as (1, out)."""
    params = []
    for (din, dout) in LAYER_DIMS:
        key, kw, kb = jax.random.split(key, 3)
        bound = 1.0 / math.sqrt(din)
        w = jax.random.uniform(kw, (din, dout), jnp.float32, -bound, bound)
        b = jax.random.uniform(kb, (1, dout), jnp.float32, -bound, bound)
        params.append(w)
        params.append(b)
    return params


def pack_params(params, compute_dtype=jnp.float32):
    """Pack all 12 weights (zero-padded to 128x128) into one (128, 12*128) buffer
    and all biases into one (1, 12*128) f32 buffer.  Padded weight/bias columns are
    exactly 0, so pad lanes of the activations stay 0 through the ReLU chain."""
    w_packed = jnp.zeros((PAD, N_LAYERS * PAD), compute_dtype)
    b_packed = jnp.zeros((1, N_LAYERS * PAD), jnp.float32)
    for i, (din, dout) in enumerate(LAYER_DIMS):
        w = params[2 * i].astype(compute_dtype)
        b = params[2 * i + 1]
        w_packed = w_packed.at[:din, i * PAD:i * PAD + dout].set(w)
        b_packed = b_packed.at[:, i * PAD:i * PAD + dout].set(b)
    return w_packed, b_packed


def mlp_reference(x, params, compute_dtype=jnp.float32):
    """Pure-JAX reference (optionally with the same bf16 weight/activation
    rounding the kernel applies)."""
    h = x
    for i in range(N_LAYERS):
        w = params[2 * i].astype(compute_dtype)
        b = params[2 * i + 1]
        h = jnp.dot(h.astype(compute_dtype), w,
                    preferred_element_type=jnp.float32) + b
        if i < N_LAYERS - 1:
            h = jnp.maximum(h, 0.0)
    return h


if __name__ == "__main__":
    key = jax.random.PRNGKey(0)
    key, kx1, kx2, kx3 = jax.random.split(key, 4)
    params = init_params(key)

    # Packed parameter buffers: f32 (exact) and bf16 (fast MXU path, mainly for v5e).
    w32, b32 = pack_params(params, jnp.float32)
    w16, b16 = pack_params(params, jnp.bfloat16)

    # 1) tiny batch: single 128-row granule, grid of 1
    x_small = jax.random.normal(kx1, (8, 4 * 30), jnp.float32)
    out_s = jax.block_until_ready(mlp_forward(x_small, w32, b32))
    ref_s = mlp_reference(x_small, params)
    assert out_s.shape == (8, 1)
    assert jnp.allclose(out_s, ref_s, atol=2e-4, rtol=2e-4), "f32 small-batch mismatch"

    # 2) non-multiple batch: several output granules, single grid step
    x_mid = jax.random.normal(kx2, (300, 4 * 30), jnp.float32)
    out_m = jax.block_until_ready(mlp_forward(x_mid, w32, b32))
    ref_m = mlp_reference(x_mid, params)
    assert out_m.shape == (300, 1)
    assert jnp.allclose(out_m, ref_m, atol=2e-4, rtol=2e-4), "f32 mid-batch mismatch"

    # 3) larger batch: multi-step parallel grid with an uneven last tile
    x_big = jax.random.normal(kx3, (2500, 4 * 30), jnp.float32)
    out_b = jax.block_until_ready(mlp_forward(x_big, w32, b32, block_b=1024))
    ref_b = mlp_reference(x_big, params)
    assert out_b.shape == (2500, 1)
    assert jnp.allclose(out_b, ref_b, atol=2e-4, rtol=2e-4), "f32 big-batch mismatch"

    # 4) bf16 weight/matmul path, checked against a bf16-rounded reference
    out_h = jax.block_until_ready(mlp_forward(x_big, w16, b16, block_b=1024))
    ref_h = mlp_reference(x_big, params, compute_dtype=jnp.bfloat16)
    assert jnp.allclose(out_h, ref_h, atol=3e-3, rtol=3e-3), "bf16 mismatch"

    print("KERNEL_OK")
</pallas_src>

<mosaic_0001>
module attributes {stable_mosaic.version = 11 : i64} {
  func.func @mlp_kernel(%arg0: i32, %arg1: memref<128x120xf32, #tpu.memory_space<vmem>>, %arg2: memref<128x1536xf32, #tpu.memory_space<vmem>>, %arg3: memref<1x1536xf32, #tpu.memory_space<vmem>>, %arg4: memref<1x128xf32, #tpu.memory_space<vmem>>) attributes {dimension_semantics = [#tpu.dimension_semantics<parallel>], iteration_bounds = array<i64: 1>, scalar_prefetch = 0 : i64, scratch_operands = 0 : i64, tpu.core_type = #tpu.core_type<tc>, window_params = [{transform_indices = @transform_0, window_bounds = array<i64: 128, 120>}, {pipeline_mode = #tpu.pipeline_mode<synchronous>, transform_indices = @transform_1, window_bounds = array<i64: 128, 1536>}, {pipeline_mode = #tpu.pipeline_mode<synchronous>, transform_indices = @transform_2, window_bounds = array<i64: 1, 1536>}, {transform_indices = @transform_3, window_bounds = array<i64: 1, 128>}]} {
    %c0 = arith.constant 0 : index
    %c0_0 = arith.constant 0 : index
    %0 = vector.load %arg1[%c0, %c0_0] : memref<128x120xf32, #tpu.memory_space<vmem>>, vector<128x120xf32>
    %c0_1 = arith.constant 0 : index
    %c0_2 = arith.constant 0 : index
    %1 = vector.load %arg2[%c0_1, %c0_2] : memref<128x1536xf32, #tpu.memory_space<vmem>>, vector<120x128xf32>
    %c0_3 = arith.constant 0 : index
    %c0_4 = arith.constant 0 : index
    %2 = vector.load %arg3[%c0_3, %c0_4] : memref<1x1536xf32, #tpu.memory_space<vmem>>, vector<1x128xf32>
    %cst = arith.constant dense<0.000000e+00> : vector<128x128xf32>
    %3 = tpu.matmul %0, %1, %cst {dimension_numbers = #tpu.dot_dimension_numbers<[1], [0], [0], [1], [0, 0, 1, 1], [], []>} : vector<128x120xf32>, vector<120x128xf32>, vector<128x128xf32> -> vector<128x128xf32>
    %4 = vector.broadcast %2 : vector<1x128xf32> to vector<128x128xf32>
    %5 = arith.addf %3, %4 : vector<128x128xf32>
    %cst_5 = arith.constant 0.000000e+00 : f32
    %6 = vector.broadcast %cst_5 : f32 to vector<128x128xf32>
    %7 = arith.maximumf %5, %6 : vector<128x128xf32>
    %c0_6 = arith.constant 0 : index
    %c128 = arith.constant 128 : index
    %8 = vector.load %arg2[%c0_6, %c128] : memref<128x1536xf32, #tpu.memory_space<vmem>>, vector<128x128xf32>
    %c0_7 = arith.constant 0 : index
    %c128_8 = arith.constant 128 : index
    %9 = vector.load %arg3[%c0_7, %c128_8] : memref<1x1536xf32, #tpu.memory_space<vmem>>, vector<1x128xf32>
    %cst_9 = arith.constant dense<0.000000e+00> : vector<128x128xf32>
    %10 = tpu.matmul %7, %8, %cst_9 {dimension_numbers = #tpu.dot_dimension_numbers<[1], [0], [0], [1], [0, 0, 1, 1], [], []>} : vector<128x128xf32>, vector<128x128xf32>, vector<128x128xf32> -> vector<128x128xf32>
    %11 = vector.broadcast %9 : vector<1x128xf32> to vector<128x128xf32>
    %12 = arith.addf %10, %11 : vector<128x128xf32>
    %cst_10 = arith.constant 0.000000e+00 : f32
    %13 = vector.broadcast %cst_10 : f32 to vector<128x128xf32>
    %14 = arith.maximumf %12, %13 : vector<128x128xf32>
    %c0_11 = arith.constant 0 : index
    %c256 = arith.constant 256 : index
    %15 = vector.load %arg2[%c0_11, %c256] : memref<128x1536xf32, #tpu.memory_space<vmem>>, vector<128x128xf32>
    %c0_12 = arith.constant 0 : index
    %c256_13 = arith.constant 256 : index
    %16 = vector.load %arg3[%c0_12, %c256_13] : memref<1x1536xf32, #tpu.memory_space<vmem>>, vector<1x128xf32>
    %cst_14 = arith.constant dense<0.000000e+00> : vector<128x128xf32>
    %17 = tpu.matmul %14, %15, %cst_14 {dimension_numbers = #tpu.dot_dimension_numbers<[1], [0], [0], [1], [0, 0, 1, 1], [], []>} : vector<128x128xf32>, vector<128x128xf32>, vector<128x128xf32> -> vector<128x128xf32>
    %18 = vector.broadcast %16 : vector<1x128xf32> to vector<128x128xf32>
    %19 = arith.addf %17, %18 : vector<128x128xf32>
    %cst_15 = arith.constant 0.000000e+00 : f32
    %20 = vector.broadcast %cst_15 : f32 to vector<128x128xf32>
    %21 = arith.maximumf %19, %20 : vector<128x128xf32>
    %c0_16 = arith.constant 0 : index
    %c384 = arith.constant 384 : index
    %22 = vector.load %arg2[%c0_16, %c384] : memref<128x1536xf32, #tpu.memory_space<vmem>>, vector<128x128xf32>
    %c0_17 = arith.constant 0 : index
    %c384_18 = arith.constant 384 : index
    %23 = vector.load %arg3[%c0_17, %c384_18] : memref<1x1536xf32, #tpu.memory_space<vmem>>, vector<1x128xf32>
    %cst_19 = arith.constant dense<0.000000e+00> : vector<128x128xf32>
    %24 = tpu.matmul %21, %22, %cst_19 {dimension_numbers = #tpu.dot_dimension_numbers<[1], [0], [0], [1], [0, 0, 1, 1], [], []>} : vector<128x128xf32>, vector<128x128xf32>, vector<128x128xf32> -> vector<128x128xf32>
    %25 = vector.broadcast %23 : vector<1x128xf32> to vector<128x128xf32>
    %26 = arith.addf %24, %25 : vector<128x128xf32>
    %cst_20 = arith.constant 0.000000e+00 : f32
    %27 = vector.broadcast %cst_20 : f32 to vector<128x128xf32>
    %28 = arith.maximumf %26, %27 : vector<128x128xf32>
    %c0_21 = arith.constant 0 : index
    %c512 = arith.constant 512 : index
    %29 = vector.load %arg2[%c0_21, %c512] : memref<128x1536xf32, #tpu.memory_space<vmem>>, vector<128x128xf32>
    %c0_22 = arith.constant 0 : index
    %c512_23 = arith.constant 512 : index
    %30 = vector.load %arg3[%c0_22, %c512_23] : memref<1x1536xf32, #tpu.memory_space<vmem>>, vector<1x128xf32>
    %cst_24 = arith.constant dense<0.000000e+00> : vector<128x128xf32>
    %31 = tpu.matmul %28, %29, %cst_24 {dimension_numbers = #tpu.dot_dimension_numbers<[1], [0], [0], [1], [0, 0, 1, 1], [], []>} : vector<128x128xf32>, vector<128x128xf32>, vector<128x128xf32> -> vector<128x128xf32>
    %32 = vector.broadcast %30 : vector<1x128xf32> to vector<128x128xf32>
    %33 = arith.addf %31, %32 : vector<128x128xf32>
    %cst_25 = arith.constant 0.000000e+00 : f32
    %34 = vector.broadcast %cst_25 : f32 to vector<128x128xf32>
    %35 = arith.maximumf %33, %34 : vector<128x128xf32>
    %c0_26 = arith.constant 0 : index
    %c640 = arith.constant 640 : index
    %36 = vector.load %arg2[%c0_26, %c640] : memref<128x1536xf32, #tpu.memory_space<vmem>>, vector<128x128xf32>
    %c0_27 = arith.constant 0 : index
    %c640_28 = arith.constant 640 : index
    %37 = vector.load %arg3[%c0_27, %c640_28] : memref<1x1536xf32, #tpu.memory_space<vmem>>, vector<1x128xf32>
    %cst_29 = arith.constant dense<0.000000e+00> : vector<128x128xf32>
    %38 = tpu.matmul %35, %36, %cst_29 {dimension_numbers = #tpu.dot_dimension_numbers<[1], [0], [0], [1], [0, 0, 1, 1], [], []>} : vector<128x128xf32>, vector<128x128xf32>, vector<128x128xf32> -> vector<128x128xf32>
    %39 = vector.broadcast %37 : vector<1x128xf32> to vector<128x128xf32>
    %40 = arith.addf %38, %39 : vector<128x128xf32>
    %cst_30 = arith.constant 0.000000e+00 : f32
    %41 = vector.broadcast %cst_30 : f32 to vector<128x128xf32>
    %42 = arith.maximumf %40, %41 : vector<128x128xf32>
    %c0_31 = arith.constant 0 : index
    %c768 = arith.constant 768 : index
    %43 = vector.load %arg2[%c0_31, %c768] : memref<128x1536xf32, #tpu.memory_space<vmem>>, vector<128x128xf32>
    %c0_32 = arith.constant 0 : index
    %c768_33 = arith.constant 768 : index
    %44 = vector.load %arg3[%c0_32, %c768_33] : memref<1x1536xf32, #tpu.memory_space<vmem>>, vector<1x128xf32>
    %cst_34 = arith.constant dense<0.000000e+00> : vector<128x128xf32>
    %45 = tpu.matmul %42, %43, %cst_34 {dimension_numbers = #tpu.dot_dimension_numbers<[1], [0], [0], [1], [0, 0, 1, 1], [], []>} : vector<128x128xf32>, vector<128x128xf32>, vector<128x128xf32> -> vector<128x128xf32>
    %46 = vector.broadcast %44 : vector<1x128xf32> to vector<128x128xf32>
    %47 = arith.addf %45, %46 : vector<128x128xf32>
    %cst_35 = arith.constant 0.000000e+00 : f32
    %48 = vector.broadcast %cst_35 : f32 to vector<128x128xf32>
    %49 = arith.maximumf %47, %48 : vector<128x128xf32>
    %c0_36 = arith.constant 0 : index
    %c896 = arith.constant 896 : index
    %50 = vector.load %arg2[%c0_36, %c896] : memref<128x1536xf32, #tpu.memory_space<vmem>>, vector<128x128xf32>
    %c0_37 = arith.constant 0 : index
    %c896_38 = arith.constant 896 : index
    %51 = vector.load %arg3[%c0_37, %c896_38] : memref<1x1536xf32, #tpu.memory_space<vmem>>, vector<1x128xf32>
    %cst_39 = arith.constant dense<0.000000e+00> : vector<128x128xf32>
    %52 = tpu.matmul %49, %50, %cst_39 {dimension_numbers = #tpu.dot_dimension_numbers<[1], [0], [0], [1], [0, 0, 1, 1], [], []>} : vector<128x128xf32>, vector<128x128xf32>, vector<128x128xf32> -> vector<128x128xf32>
    %53 = vector.broadcast %51 : vector<1x128xf32> to vector<128x128xf32>
    %54 = arith.addf %52, %53 : vector<128x128xf32>
    %cst_40 = arith.constant 0.000000e+00 : f32
    %55 = vector.broadcast %cst_40 : f32 to vector<128x128xf32>
    %56 = arith.maximumf %54, %55 : vector<128x128xf32>
    %c0_41 = arith.constant 0 : index
    %c1024 = arith.constant 1024 : index
    %57 = vector.load %arg2[%c0_41, %c1024] : memref<128x1536xf32, #tpu.memory_space<vmem>>, vector<128x128xf32>
    %c0_42 = arith.constant 0 : index
    %c1024_43 = arith.constant 1024 : index
    %58 = vector.load %arg3[%c0_42, %c1024_43] : memref<1x1536xf32, #tpu.memory_space<vmem>>, vector<1x128xf32>
    %cst_44 = arith.constant dense<0.000000e+00> : vector<128x128xf32>
    %59 = tpu.matmul %56, %57, %cst_44 {dimension_numbers = #tpu.dot_dimension_numbers<[1], [0], [0], [1], [0, 0, 1, 1], [], []>} : vector<128x128xf32>, vector<128x128xf32>, vector<128x128xf32> -> vector<128x128xf32>
    %60 = vector.broadcast %58 : vector<1x128xf32> to vector<128x128xf32>
    %61 = arith.addf %59, %60 : vector<128x128xf32>
    %cst_45 = arith.constant 0.000000e+00 : f32
    %62 = vector.broadcast %cst_45 : f32 to vector<128x128xf32>
    %63 = arith.maximumf %61, %62 : vector<128x128xf32>
    %c0_46 = arith.constant 0 : index
    %c1152 = arith.constant 1152 : index
    %64 = vector.load %arg2[%c0_46, %c1152] : memref<128x1536xf32, #tpu.memory_space<vmem>>, vector<128x128xf32>
    %c0_47 = arith.constant 0 : index
    %c1152_48 = arith.constant 1152 : index
    %65 = vector.load %arg3[%c0_47, %c1152_48] : memref<1x1536xf32, #tpu.memory_space<vmem>>, vector<1x128xf32>
    %cst_49 = arith.constant dense<0.000000e+00> : vector<128x128xf32>
    %66 = tpu.matmul %63, %64, %cst_49 {dimension_numbers = #tpu.dot_dimension_numbers<[1], [0], [0], [1], [0, 0, 1, 1], [], []>} : vector<128x128xf32>, vector<128x128xf32>, vector<128x128xf32> -> vector<128x128xf32>
    %67 = vector.broadcast %65 : vector<1x128xf32> to vector<128x128xf32>
    %68 = arith.addf %66, %67 : vector<128x128xf32>
    %cst_50 = arith.constant 0.000000e+00 : f32
    %69 = vector.broadcast %cst_50 : f32 to vector<128x128xf32>
    %70 = arith.maximumf %68, %69 : vector<128x128xf32>
    %c0_51 = arith.constant 0 : index
    %c1280 = arith.constant 1280 : index
    %71 = vector.load %arg2[%c0_51, %c1280] : memref<128x1536xf32, #tpu.memory_space<vmem>>, vector<128x128xf32>
    %c0_52 = arith.constant 0 : index
    %c1280_53 = arith.constant 1280 : index
    %72 = vector.load %arg3[%c0_52, %c1280_53] : memref<1x1536xf32, #tpu.memory_space<vmem>>, vector<1x128xf32>
    %cst_54 = arith.constant dense<0.000000e+00> : vector<128x128xf32>
    %73 = tpu.matmul %70, %71, %cst_54 {dimension_numbers = #tpu.dot_dimension_numbers<[1], [0], [0], [1], [0, 0, 1, 1], [], []>} : vector<128x128xf32>, vector<128x128xf32>, vector<128x128xf32> -> vector<128x128xf32>
    %74 = vector.broadcast %72 : vector<1x128xf32> to vector<128x128xf32>
    %75 = arith.addf %73, %74 : vector<128x128xf32>
    %cst_55 = arith.constant 0.000000e+00 : f32
    %76 = vector.broadcast %cst_55 : f32 to vector<128x128xf32>
    %77 = arith.maximumf %75, %76 : vector<128x128xf32>
    %c0_56 = arith.constant 0 : index
    %c1408 = arith.constant 1408 : index
    %78 = vector.load %arg2[%c0_56, %c1408] : memref<128x1536xf32, #tpu.memory_space<vmem>>, vector<128x128xf32>
    %c0_57 = arith.constant 0 : index
    %c1408_58 = arith.constant 1408 : index
    %79 = vector.load %arg3[%c0_57, %c1408_58] : memref<1x1536xf32, #tpu.memory_space<vmem>>, vector<1x128xf32>
    %cst_59 = arith.constant dense<0.000000e+00> : vector<128x128xf32>
    %80 = tpu.matmul %77, %78, %cst_59 {dimension_numbers = #tpu.dot_dimension_numbers<[1], [0], [0], [1], [0, 0, 1, 1], [], []>} : vector<128x128xf32>, vector<128x128xf32>, vector<128x128xf32> -> vector<128x128xf32>
    %81 = vector.broadcast %79 : vector<1x128xf32> to vector<128x128xf32>
    %82 = arith.addf %80, %81 : vector<128x128xf32>
    %83 = tpu.transpose %82, [1, 0] : vector<128x128xf32> -> vector<128x128xf32>
    %84 = vector.extract_strided_slice %83 {offsets = [0, 0], sizes = [1, 128], strides = [1, 1]} : vector<128x128xf32> to vector<1x128xf32>
    %c0_60 = arith.constant 0 : index
    %c0_61 = arith.constant 0 : index
    %85 = vector.load %arg4[%c0_60, %c0_61] : memref<1x128xf32, #tpu.memory_space<vmem>>, vector<1x128xf32>
    tpu.vector_store %arg4[%c0_60, %c0_61], %84 {strides = array<i32>} : memref<1x128xf32, #tpu.memory_space<vmem>>, vector<1x128xf32>,
    return
  }
  func.func @transform_0(%arg0: i32) -> (i32, i32) {
    %c0_i32 = arith.constant 0 : i32
    %c0_i32_0 = arith.constant 0 : i32
    return %arg0, %c0_i32 : i32, i32
  }
  func.func @transform_1(%arg0: i32) -> (i32, i32) {
    %c0_i32 = arith.constant 0 : i32
    %c0_i32_0 = arith.constant 0 : i32
    %c0_i32_1 = arith.constant 0 : i32
    return %c0_i32, %c0_i32_0 : i32, i32
  }
  func.func @transform_2(%arg0: i32) -> (i32, i32) {
    %c0_i32 = arith.constant 0 : i32
    %c0_i32_0 = arith.constant 0 : i32
    %c0_i32_1 = arith.constant 0 : i32
    return %c0_i32, %c0_i32_0 : i32, i32
  }
  func.func @transform_3(%arg0: i32) -> (i32, i32) {
    %c0_i32 = arith.constant 0 : i32
    %c0_i32_0 = arith.constant 0 : i32
    return %arg0, %c0_i32 : i32, i32
  }
}

</mosaic_0001>

<bundles_post_ra>
// kernel: mlp_forward.1
= control target key start
LH: loop header
LB: loop body
LE: loop exit
PB: predicated region body
PF: predicated region fallthrough
CT: control target
= control target key end

     0   :  { %8 = vsyncpa [#allocation3], 0  ;;  %s3968_s0 = inlined_call_operand.hbm [shape: f32[8,120], index: 0, kind: input, shape index: {}]   ;;  %s3969_s1 = inlined_call_operand.hbm [shape: f32[128,1536], index: 1, kind: input, shape index: {}]   ;;  %s3970_s2 = inlined_call_operand.hbm [shape: f32[1,1536], index: 2, kind: input, shape index: {}]   ;;  %s3971_s3 = inlined_call_operand.vmem [shape: f32[1,128], index: 3, kind: output, shape index: {}]  }
   0x1   :  { %9 = vsyncpa [#allocation5], 0 }
   0x2   :  { %14 = vsyncadd [#allocation3], 1920  ;;  %s3886_s12 = smov [#allocation4]   ;;  %s3816_s16 = scalar_lea.hbm %s3969_s1, 24576 }
   0x3   :  { %s27_s13 = sshll.u32 %s3886_s12, 4  ;;  %p3817_p0 = scmp.ne.s32.totalorder %s3969_s1, %s3816_s16  ;;  %s28_s13 = int_to_ptr.vmem [resolvable:$true] %s27_s13 }
   0x4   :  { %p3820_p1 = scmp.lt.u32.totalorder %s3816_s16, %s3969_s1 }
   0x6   :  { %p3822_p2 = pnand %p3820_p1, %p3817_p0 }
   0x8   :  { %3825 = shalt.err (!%p3822_p2)
}
   0x9   :  { %s3826_s21 = scalar_lea.vmem %s28_s13, 24576  ;;  %p3831_p4 = scmp.lt.s32.totalorder %s28_s13, %s28_s13 }
   0xa   :  { %p3827_p3 = scmp.ne.s32.totalorder %s28_s13, %s3826_s21  ;;  %p3832_p5 = scmp.lt.s32.totalorder %s3826_s21, %s3826_s21 }
   0xc   :  { %p3833_p6 = por %p3832_p5, %p3831_p4 }
   0xe   :  { %p3834_p7 = pnand %p3833_p6, %p3827_p3 }
  0x10   :  { %3837 = shalt.err (!%p3834_p7)
}
  0x11   :  { %s3887_s22 = smov 1536   ;;  %s3888_s23 = smov 96  }
  0x12   :  { %33 = dma.hbm_to_vmem [thread:$0]  %s3969_s1, 24576, %s28_s13, [#allocation5], %s3887_s22, %s3887_s22, %s3888_s23  }
  0x13   :  { %s3889_s26 = smov [#allocation2]   ;;  %s3838_s30 = scalar_lea.hbm %s3968_s0, 128 }
  0x14   :  { %s15_s27 = sshll.u32 %s3889_s26, 4  ;;  %p3839_p8 = scmp.ne.s32.totalorder %s3968_s0, %s3838_s30  ;;  %s16_s27 = int_to_ptr.vmem [resolvable:$true] %s15_s27 }
  0x15   :  { %p3842_p9 = scmp.lt.u32.totalorder %s3838_s30, %s3968_s0 }
  0x17   :  { %p3844_p10 = pnand %p3842_p9, %p3839_p8 }
  0x19   :  { %3847 = shalt.err (!%p3844_p10)
}
  0x1a   :  { %s3848_s8 = scalar_lea.vmem %s16_s27, 128  ;;  %s3852_s1 = scalar_lea.vmem %s16_s27, 2048 }
  0x1b   :  { %p3849_p11 = scmp.ne.s32.totalorder %s16_s27, %s3848_s8  ;;  %p3853_p12 = scmp.lt.s32.totalorder %s16_s27, %s16_s27 }
  0x1c   :  { %p3854_p13 = scmp.lt.s32.totalorder %s3852_s1, %s3848_s8 }
  0x1e   :  { %p3855_p0 = por %p3854_p13, %p3853_p12 }
  0x20   :  { %p3856_p1 = pnand %p3855_p0, %p3849_p11 }
  0x22   :  { %3859 = shalt.err (!%p3856_p1)
}
  0x23   :  { %s3890_s9 = smov 128   ;;  %s3891_s10 = smov 8  }
  0x24   :  { %21 = dma.hbm_to_vmem [thread:$0]  %s3968_s0, 128, %s16_s27, [#allocation3], %s3890_s9, %s3890_s9, %s3891_s10  }
  0x25   :  { %s3892_s13 = smov [#allocation6]   ;;  %s3860_s17 = scalar_lea.hbm %s3970_s2, 192 }
  0x26   :  { %s40_s14 = sshll.u32 %s3892_s13, 4  ;;  %p3861_p2 = scmp.ne.s32.totalorder %s3970_s2, %s3860_s17  ;;  %s41_s14 = int_to_ptr.vmem [resolvable:$true] %s40_s14 }
  0x27   :  { %p3864_p3 = scmp.lt.u32.totalorder %s3860_s17, %s3970_s2 }
  0x29   :  { %p3866_p4 = pnand %p3864_p3, %p3861_p2 }
  0x2b   :  { %3869 = shalt.err (!%p3866_p4)
}
  0x2c   :  { %s3870_s22 = scalar_lea.vmem %s41_s14, 192  ;;  %p3875_p6 = scmp.lt.s32.totalorder %s41_s14, %s41_s14 }
  0x2d   :  { %p3871_p5 = scmp.ne.s32.totalorder %s41_s14, %s3870_s22  ;;  %p3876_p7 = scmp.lt.s32.totalorder %s3870_s22, %s3870_s22 }
  0x2f   :  { %p3877_p8 = por %p3876_p7, %p3875_p6 }
  0x31   :  { %p3878_p9 = pnand %p3877_p8, %p3871_p5 }
  0x33   :  { %3881 = shalt.err (!%p3878_p9)
}
  0x34   :  { %43 = dma.hbm_to_vmem [thread:$0]  %s3970_s2, 192, %s41_s14, [#allocation5]  }
  0x35   :  { %3882 = dma.done.wait [#allocation3], 2048  }
  0x36   :  { %3883 = vsyncadd [#allocation3], 4294965248 }
  0x37   :  { %3884 = dma.done.wait [#allocation5], 24768  }
  0x38   :  { %3885 = vsyncadd [#allocation5], 4294942528  ;;  %v69_v0 = vld [vmem:[#allocation4] sm:$0xff]  ;;  %vm91_vm0 = vcmask 982016   ;;  %v301_v15 = vld [vmem:[#allocation4 + $0x8] sm:$0xff] }
  0x39   :  { %v70_v1 = vld [vmem:[#allocation4 + $0x60] sm:$0xff]  ;;  %v302_v16 = vld [vmem:[#allocation4 + $0x68] sm:$0xff]  ;;  %v55_v44 = vld [vmem:[#allocation2 + $0x10] sm:$0xff] }
  0x3a   :  { %v71_v2 = vld [vmem:[#allocation4 + $0xc0] sm:$0xff]  ;;  %v3429_v3 = vpack.c.bf16 %v70_v1, %v69_v0  ;;  %v3457_v17 = vpack.c.bf16 %v302_v16, %v301_v15  ;;  %v303_v18 = vld [vmem:[#allocation4 + $0xc8] sm:$0xff]  ;;  %v56_v46 = vld [vmem:[#allocation2 + $0x18] sm:$0xff] }
  0x3b   :  { %v72_v4 = vld [vmem:[#allocation4 + $0x120] sm:$0xff]  ;;  %v304_v19 = vld [vmem:[#allocation4 + $0x128] sm:$0xff]  ;;  %v59_v49 = vld [vmem:[#allocation2 + $0x30] sm:$0xff] }
  0x3c   :  { %v3433_v5 = vpack.c.bf16 %v72_v4, %v71_v2  ;;  %v73_v6 = vld [vmem:[#allocation4 + $0x180] sm:$0xff]  ;;  %3430 = vmatprep.subr.bf16.mxu0 %v3429_v3  ;;  %v3461_v20 = vpack.c.bf16 %v304_v19, %v303_v18  ;;  %v305_v21 = vld [vmem:[#allocation4 + $0x188] sm:$0xff]  ;;  %3458 = vmatprep.subr.bf16.mxu1 %v3457_v17  ;;  %v60_v50 = vld [vmem:[#allocation2 + $0x38] sm:$0xff] }
  0x3d   :  { %v74_v7 = vld [vmem:[#allocation4 + $0x1e0] sm:$0xff]  ;;  %3432 = vmatpush3.bf16.msra.mxu0 %v3429_v3  ;;  %v306_v22 = vld [vmem:[#allocation4 + $0x1e8] sm:$0xff]  ;;  %3460 = vmatpush3.bf16.msra.mxu1 %v3457_v17  ;;  %v63_v53 = vld [vmem:[#allocation2 + $0x50] sm:$0xff] }
  0x3e   :  { %3434 = vmatprep.subr.bf16.mxu0 %v3433_v5  ;;  %v3437_v8 = vpack.c.bf16 %v74_v7, %v73_v6  ;;  %v53_v9 = vld [vmem:[#allocation2] sm:$0xff]  ;;  %3462 = vmatprep.subr.bf16.mxu1 %v3461_v20  ;;  %v3465_v26 = vpack.c.bf16 %v306_v22, %v305_v21  ;;  %v307_v27 = vld [vmem:[#allocation4 + $0x248] sm:$0xff]  ;;  %v64_v54 = vld [vmem:[#allocation2 + $0x58] sm:$0xff] }
  0x3f   :  { %v75_v10 = vld [vmem:[#allocation4 + $0x240] sm:$0xff]  ;;  %2789 = vmatprep.mubr.msk.f32.mxu0 %vm91_vm0, %v53_v9  ;;  %v308_v28 = vld [vmem:[#allocation4 + $0x2a8] sm:$0xff]  ;;  %v67_v57 = vld [vmem:[#allocation2 + $0x70] sm:$0xff] }
  0x40   :  { %v76_v11 = vld [vmem:[#allocation4 + $0x2a0] sm:$0xff]  ;;  %v3469_v32 = vpack.c.bf16 %v308_v28, %v307_v27  ;;  %v309_v33 = vld [vmem:[#allocation4 + $0x308] sm:$0xff]  ;;  %v68_v58 = vld [vmem:[#allocation2 + $0x78] sm:$0xff] }
  0x41   :  { %3436 = vmatpush3.bf16.msra.mxu0 %v3433_v5  ;;  %v3441_v12 = vpack.c.bf16 %v76_v11, %v75_v10  ;;  %v77_v13 = vld [vmem:[#allocation4 + $0x300] sm:$0xff]  ;;  %3464 = vmatpush3.bf16.msra.mxu1 %v3461_v20  ;;  %v310_v34 = vld [vmem:[#allocation4 + $0x368] sm:$0xff]  ;;  %v485_v62 = vld [vmem:[#allocation4 + $0x10] sm:$0xff] }
  0x42   :  { %3438 = vmatprep.subr.bf16.mxu0 %v3437_v8  ;;  %v78_v14 = vld [vmem:[#allocation4 + $0x360] sm:$0xff]  ;;  %3466 = vmatprep.subr.bf16.mxu1 %v3465_v26  ;;  %v3473_v36 = vpack.c.bf16 %v310_v34, %v309_v33  ;;  %v311_v37 = vld [vmem:[#allocation4 + $0x3c8] sm:$0xff]  ;;  %v486_v63 = vld [vmem:[#allocation4 + $0x70] sm:$0xff] }
  0x43   :  { %v3445_v23 = vpack.c.bf16 %v78_v14, %v77_v13  ;;  %v79_v24 = vld [vmem:[#allocation4 + $0x3c0] sm:$0xff]  ;;  %v312_v38 = vld [vmem:[#allocation4 + $0x428] sm:$0xff]  ;;  %v487_v0 = vld [vmem:[#allocation4 + $0xd0] sm:$0xff]  ;;  %v3489_v1 = vpack.c.bf16 %v486_v63, %v485_v62 }
  0x44   :  { %v80_v25 = vld [vmem:[#allocation4 + $0x420] sm:$0xff]  ;;  %v3477_v40 = vpack.c.bf16 %v312_v38, %v311_v37  ;;  %v313_v41 = vld [vmem:[#allocation4 + $0x488] sm:$0xff]  ;;  %v488_v2 = vld [vmem:[#allocation4 + $0x130] sm:$0xff] }
  0x45   :  { %3440 = vmatpush3.bf16.msra.mxu0 %v3437_v8  ;;  %v3449_v29 = vpack.c.bf16 %v80_v25, %v79_v24  ;;  %v81_v30 = vld [vmem:[#allocation4 + $0x480] sm:$0xff]  ;;  %3468 = vmatpush3.bf16.msra.mxu1 %v3465_v26  ;;  %v314_v42 = vld [vmem:[#allocation4 + $0x4e8] sm:$0xff]  ;;  %v3493_v3 = vpack.c.bf16 %v488_v2, %v487_v0  ;;  %v489_v4 = vld [vmem:[#allocation4 + $0x190] sm:$0xff] }
  0x46   :  { %3442 = vmatprep.subr.bf16.mxu0 %v3441_v12  ;;  %v82_v31 = vld [vmem:[#allocation4 + $0x4e0] sm:$0xff]  ;;  %3470 = vmatprep.subr.bf16.mxu1 %v3469_v32  ;;  %v54_v43 = vld [vmem:[#allocation2 + $0x8] sm:$0xff]  ;;  %v3481_v45 = vpack.c.bf16 %v314_v42, %v313_v41  ;;  %v490_v5 = vld [vmem:[#allocation4 + $0x1f0] sm:$0xff] }
  0x47   :  { %v3453_v35 = vpack.c.bf16 %v82_v31, %v81_v30  ;;  %v83_v39 = vld [vmem:[#allocation4 + $0x540] sm:$0xff]  ;;  %v58_v48 = vld [vmem:[#allocation2 + $0x28] sm:$0xff]  ;;  %v3497_v6 = vpack.c.bf16 %v490_v5, %v489_v4  ;;  %v491_v7 = vld [vmem:[#allocation4 + $0x250] sm:$0xff] }
  0x48   :  { %v57_v47 = vld [vmem:[#allocation2 + $0x20] sm:$0xff]  ;;  %v62_v52 = vld [vmem:[#allocation2 + $0x48] sm:$0xff]  ;;  %v492_v8 = vld [vmem:[#allocation4 + $0x2b0] sm:$0xff] }
  0x49   :  { %3444 = vmatpush3.bf16.msra.mxu0 %v3441_v12  ;;  %3472 = vmatpush3.bf16.msra.mxu1 %v3469_v32  ;;  %v61_v51 = vld [vmem:[#allocation2 + $0x40] sm:$0xff]  ;;  %v66_v56 = vld [vmem:[#allocation2 + $0x68] sm:$0xff]  ;;  %v3501_v9 = vpack.c.bf16 %v492_v8, %v491_v7  ;;  %v493_v10 = vld [vmem:[#allocation4 + $0x310] sm:$0xff] }
  0x4a   :  { %3446 = vmatprep.subr.bf16.mxu0 %v3445_v23  ;;  %3474 = vmatprep.subr.bf16.mxu1 %v3473_v36  ;;  %v65_v55 = vld [vmem:[#allocation2 + $0x60] sm:$0xff]  ;;  %v315_v59 = vld [vmem:[#allocation4 + $0x548] sm:$0xff]  ;;  %v494_v11 = vld [vmem:[#allocation4 + $0x370] sm:$0xff] }
  0x4b   :  { %v316_v60 = vld [vmem:[#allocation4 + $0x5a8] sm:$0xff]  ;;  %v3505_v12 = vpack.c.bf16 %v494_v11, %v493_v10  ;;  %v495_v13 = vld [vmem:[#allocation4 + $0x3d0] sm:$0xff]  ;;  %v2348_v19 = vld [vmem:[#allocation6] ss:$0 sm:$0xff] }
  0x4c   :  { %v3485_v61 = vpack.c.bf16 %v316_v60, %v315_v59  ;;  %v496_v14 = vld [vmem:[#allocation4 + $0x430] sm:$0xff]  ;;  %v669_v7 = vld [vmem:[#allocation4 + $0x18] sm:$0xff] }
  0x4d   :  { %3448 = vmatpush3.bf16.msra.mxu0 %v3445_v23  ;;  %3476 = vmatpush3.bf16.msra.mxu1 %v3473_v36  ;;  %v3509_v15 = vpack.c.bf16 %v496_v14, %v495_v13  ;;  %v497_v16 = vld [vmem:[#allocation4 + $0x490] sm:$0xff]  ;;  %v670_v8 = vld [vmem:[#allocation4 + $0x78] sm:$0xff] }
  0x4e   :  { %3450 = vmatprep.subr.bf16.mxu0 %v3449_v29  ;;  %3478 = vmatprep.subr.bf16.mxu1 %v3477_v40  ;;  %v498_v17 = vld [vmem:[#allocation4 + $0x4f0] sm:$0xff]  ;;  %v3521_v10 = vpack.c.bf16 %v670_v8, %v669_v7  ;;  %v672_v11 = vld [vmem:[#allocation4 + $0x138] sm:$0xff] }
  0x4f   :  { %v3513_v18 = vpack.c.bf16 %v498_v17, %v497_v16  ;;  %v499_v4 = vld [vmem:[#allocation4 + $0x550] sm:$0xff]  ;;  %v673_v13 = vld [vmem:[#allocation4 + $0x198] sm:$0xff] }
  0x50   :  { %v500_v5 = vld [vmem:[#allocation4 + $0x5b0] sm:$0xff]  ;;  %v674_v14 = vld [vmem:[#allocation4 + $0x1f8] sm:$0xff] }
  0x51   :  { %3452 = vmatpush3.bf16.msra.mxu0 %v3449_v29  ;;  %3480 = vmatpush3.bf16.msra.mxu1 %v3477_v40  ;;  %v675_v16 = vld [vmem:[#allocation4 + $0x258] sm:$0xff] }
  0x52   :  { %3454 = vmatprep.subr.bf16.mxu0 %v3453_v35  ;;  %3482 = vmatprep.subr.bf16.mxu1 %v3481_v45  ;;  %v676_v17 = vld [vmem:[#allocation4 + $0x2b8] sm:$0xff] }
  0x55   :  { %3456 = vmatpush3.bf16.msra.mxu0 %v3453_v35  ;;  %3484 = vmatpush3.bf16.msra.mxu1 %v3481_v45 }
  0x56   :  { %2787 = vmatprep.subr.mxu0 %v83_v39  ;;  %3486 = vmatprep.subr.bf16.mxu1 %v3485_v61 }
  0x59   :  { %2788 = vmatpush3.msra.mxu0 %v83_v39  ;;  %3488 = vmatpush3.bf16.msra.mxu1 %v3485_v61 }
  0x5a   :  { %2790 = vmatmul.mubr.msk.f32.vlgmr.msra.gmra.mrb[0].mxu0 %vm91_vm0, %v54_v43  ;;  %3490 = vmatprep.subr.bf16.mxu0 %v3489_v1 }
  0x5b   :  { %2792 = vmatprep.mubr.msk.f32.mxu0 %vm91_vm0, %v55_v44  ;;  %3492 = vmatpush3.bf16.msra.mxu0 %v3489_v1 }
  0x5c   :  { %3494 = vmatprep.subr.bf16.mxu0 %v3493_v3  ;;  %3522 = vmatprep.subr.bf16.mxu1 %v3521_v10 }
  0x5e   :  { %2793 = vmatmul.mubr.msk.f32.gmra.mrb[2].mxu0 %vm91_vm0, %v56_v46 }
  0x5f   :  { %2795 = vmatprep.mubr.msk.f32.mxu0 %vm91_vm0, %v57_v47  ;;  %3496 = vmatpush3.bf16.msra.mxu0 %v3493_v3 }
  0x60   :  { %3498 = vmatprep.subr.bf16.mxu0 %v3497_v6 }
  0x62   :  { %2796 = vmatmul.mubr.msk.f32.gmra.mrb[4].mxu0 %vm91_vm0, %v58_v48 }
  0x63   :  { %2798 = vmatprep.mubr.msk.f32.mxu0 %vm91_vm0, %v59_v49  ;;  %3500 = vmatpush3.bf16.msra.mxu0 %v3497_v6  ;;  %v3517_v6 = vpack.c.bf16 %v500_v5, %v499_v4 }
  0x64   :  { %3502 = vmatprep.subr.bf16.mxu0 %v3501_v9 }
  0x66   :  { %2799 = vmatmul.mubr.msk.f32.gmra.mrb[6].mxu0 %vm91_vm0, %v60_v50 }
  0x67   :  { %2801 = vmatprep.mubr.msk.f32.mxu0 %vm91_vm0, %v61_v51  ;;  %3504 = vmatpush3.bf16.msra.mxu0 %v3501_v9  ;;  %v671_v9 = vld [vmem:[#allocation4 + $0xd8] sm:$0xff] }
  0x68   :  { %3506 = vmatprep.subr.bf16.mxu0 %v3505_v12 }
  0x6a   :  { %2802 = vmatmul.mubr.msk.f32.gmra.mrb[8].mxu0 %vm91_vm0, %v62_v52 }
  0x6b   :  { %2804 = vmatprep.mubr.msk.f32.mxu0 %vm91_vm0, %v63_v53  ;;  %3508 = vmatpush3.bf16.msra.mxu0 %v3505_v12  ;;  %v3525_v12 = vpack.c.bf16 %v672_v11, %v671_v9 }
  0x6c   :  { %3510 = vmatprep.subr.bf16.mxu0 %v3509_v15 }
  0x6e   :  { %2805 = vmatmul.mubr.msk.f32.gmra.mrb[10].mxu0 %vm91_vm0, %v64_v54 }
  0x6f   :  { %2807 = vmatprep.mubr.msk.f32.mxu0 %vm91_vm0, %v65_v55  ;;  %3512 = vmatpush3.bf16.msra.mxu0 %v3509_v15  ;;  %v3529_v15 = vpack.c.bf16 %v674_v14, %v673_v13  ;;  %v683_v13 = vld [vmem:[#allocation4 + $0x558] sm:$0xff] }
  0x70   :  { %3514 = vmatprep.subr.bf16.mxu0 %v3513_v18  ;;  %v684_v14 = vld [vmem:[#allocation4 + $0x5b8] sm:$0xff] }
  0x72   :  { %2808 = vmatmul.mubr.msk.f32.gmra.mrb[12].mxu0 %vm91_vm0, %v66_v56 }
  0x73   :  { %2810 = vmatprep.mubr.msk.f32.mxu0 %vm91_vm0, %v67_v57  ;;  %3516 = vmatpush3.bf16.msra.mxu0 %v3513_v18  ;;  %v3533_v18 = vpack.c.bf16 %v676_v17, %v675_v16  ;;  %v853_v16 = vld [vmem:[#allocation4 + $0x20] sm:$0xff] }
  0x74   :  { %3518 = vmatprep.subr.bf16.mxu0 %v3517_v6  ;;  %v854_v17 = vld [vmem:[#allocation4 + $0x80] sm:$0xff] }
  0x76   :  { %2811 = vmatmul.mubr.msk.f32.gmra.mrb[14].mxu0 %vm91_vm0, %v68_v58 }
  0x77   :  { %3520 = vmatpush3.bf16.msra.mxu0 %v3517_v6 }
 0x12d   :  { %v2791_v20 = vpop.f32.mrb[0].mxu0 }
 0x12e   :  { %v212_v21 = vadd.f32 %v2791_v20, %v2348_v19  ;;  %v206_v22 = vpop.f32.mrb[1].mxu0  ;;  %v678_v20 = vld [vmem:[#allocation4 + $0x378] sm:$0xff] }
 0x12f   :  { %v207_v23 = vadd.f32 %v2348_v19, %v206_v22  ;;  %v679_v22 = vld [vmem:[#allocation4 + $0x3d8] sm:$0xff] }
 0x130   :  { %v286_v26 = vmax.f32 %v212_v21, 0.0 }
 0x131   :  { %v2794_v24 = vpop.f32.mrb[2].mxu0  ;;  %v285_v25 = vmax.f32 %v207_v23, 0.0  ;;  %v680_v23 = vld [vmem:[#allocation4 + $0x438] sm:$0xff] }
 0x132   :  { %v222_v27 = vadd.f32 %v2794_v24, %v2348_v19  ;;  %v216_v28 = vpop.f32.mrb[3].mxu0  ;;  %v3541_v24 = vpack.c.bf16 %v680_v23, %v679_v22  ;;  %v857_v22 = vld [vmem:[#allocation4 + $0x1a0] sm:$0xff] }
 0x133   :  { %v217_v29 = vadd.f32 %v2348_v19, %v216_v28  ;;  %2845 = vmatprep.mubr.f32.mxu1 %v285_v25  ;;  %v681_v25 = vld [vmem:[#allocation4 + $0x498] sm:$0xff]  ;;  %v2365_v28 = vld [vmem:[#allocation6 + $0x1] ss:$0 sm:$0xff] }
 0x134   :  { %v288_v30 = vmax.f32 %v222_v27, 0.0  ;;  %2846 = vmatmul.mubr.f32.vlgmr.msra.gmra.mrb[0].mxu1 %v286_v26  ;;  %v682_v26 = vld [vmem:[#allocation4 + $0x4f8] sm:$0xff]  ;;  %v858_v23 = vld [vmem:[#allocation4 + $0x200] sm:$0xff] }
 0x135   :  { %v287_v31 = vmax.f32 %v217_v29, 0.0  ;;  %v2797_v32 = vpop.f32.mrb[4].mxu0  ;;  %3524 = vmatpush3.bf16.msra.mxu1 %v3521_v10  ;;  %v3545_v27 = vpack.c.bf16 %v682_v26, %v681_v25  ;;  %v859_v25 = vld [vmem:[#allocation4 + $0x260] sm:$0xff] }
 0x136   :  { %v232_v33 = vadd.f32 %v2797_v32, %v2348_v19  ;;  %v226_v34 = vpop.f32.mrb[5].mxu0  ;;  %3526 = vmatprep.subr.bf16.mxu1 %v3525_v12  ;;  %v860_v26 = vld [vmem:[#allocation4 + $0x2c0] sm:$0xff] }
 0x137   :  { %v227_v35 = vadd.f32 %v2348_v19, %v226_v34  ;;  %2848 = vmatprep.mubr.f32.mxu1 %v287_v31 }
 0x138   :  { %v290_v36 = vmax.f32 %v232_v33, 0.0  ;;  %2849 = vmatmul.mubr.f32.gmra.mrb[2].mxu1 %v288_v30 }
 0x139   :  { %v289_v37 = vmax.f32 %v227_v35, 0.0  ;;  %v2800_v38 = vpop.f32.mrb[6].mxu0  ;;  %3528 = vmatpush3.bf16.msra.mxu1 %v3525_v12 }
 0x13a   :  { %v242_v39 = vadd.f32 %v2800_v38, %v2348_v19  ;;  %v236_v40 = vpop.f32.mrb[7].mxu0  ;;  %3530 = vmatprep.subr.bf16.mxu1 %v3529_v15 }
 0x13b   :  { %v237_v41 = vadd.f32 %v2348_v19, %v236_v40  ;;  %2851 = vmatprep.mubr.f32.mxu1 %v289_v37 }
 0x13c   :  { %v292_v42 = vmax.f32 %v242_v39, 0.0  ;;  %2852 = vmatmul.mubr.f32.gmra.mrb[4].mxu1 %v290_v36 }
 0x13d   :  { %v291_v43 = vmax.f32 %v237_v41, 0.0  ;;  %v2803_v44 = vpop.f32.mrb[8].mxu0  ;;  %3532 = vmatpush3.bf16.msra.mxu1 %v3529_v15  ;;  %v3549_v15 = vpack.c.bf16 %v684_v14, %v683_v13 }
 0x13e   :  { %v252_v45 = vadd.f32 %v2803_v44, %v2348_v19  ;;  %v246_v46 = vpop.f32.mrb[9].mxu0  ;;  %3534 = vmatprep.subr.bf16.mxu1 %v3533_v18 }
 0x13f   :  { %v247_v47 = vadd.f32 %v2348_v19, %v246_v46  ;;  %2854 = vmatprep.mubr.f32.mxu1 %v291_v43 }
 0x140   :  { %v294_v48 = vmax.f32 %v252_v45, 0.0  ;;  %2855 = vmatmul.mubr.f32.gmra.mrb[6].mxu1 %v292_v42 }
 0x141   :  { %v293_v49 = vmax.f32 %v247_v47, 0.0  ;;  %v2806_v50 = vpop.f32.mrb[10].mxu0  ;;  %3536 = vmatpush3.bf16.msra.mxu1 %v3533_v18  ;;  %v855_v18 = vld [vmem:[#allocation4 + $0xe0] sm:$0xff] }
 0x142   :  { %v262_v51 = vadd.f32 %v2806_v50, %v2348_v19  ;;  %v256_v52 = vpop.f32.mrb[11].mxu0 }
 0x143   :  { %v257_v53 = vadd.f32 %v2348_v19, %v256_v52  ;;  %2857 = vmatprep.mubr.f32.mxu1 %v293_v49 }
 0x144   :  { %v296_v54 = vmax.f32 %v262_v51, 0.0  ;;  %2858 = vmatmul.mubr.f32.gmra.mrb[8].mxu1 %v294_v48 }
 0x145   :  { %v295_v55 = vmax.f32 %v257_v53, 0.0  ;;  %v2809_v56 = vpop.f32.mrb[12].mxu0 }
 0x146   :  { %v272_v57 = vadd.f32 %v2809_v56, %v2348_v19  ;;  %v266_v58 = vpop.f32.mrb[13].mxu0 }
 0x147   :  { %v267_v59 = vadd.f32 %v2348_v19, %v266_v58  ;;  %2860 = vmatprep.mubr.f32.mxu1 %v295_v55 }
 0x148   :  { %v298_v60 = vmax.f32 %v272_v57, 0.0  ;;  %2861 = vmatmul.mubr.f32.gmra.mrb[10].mxu1 %v296_v54 }
 0x149   :  { %v297_v61 = vmax.f32 %v267_v59, 0.0  ;;  %v2812_v62 = vpop.f32.mrb[14].mxu0 }
 0x14a   :  { %v282_v63 = vadd.f32 %v2812_v62, %v2348_v19  ;;  %v276_v0 = vpop.f32.mrb[15].mxu0 }
 0x14b   :  { %2863 = vmatprep.mubr.f32.mxu1 %v297_v61  ;;  %v277_v1 = vadd.f32 %v2348_v19, %v276_v0  ;;  %v677_v19 = vld [vmem:[#allocation4 + $0x318] sm:$0xff] }
 0x14c   :  { %2864 = vmatmul.mubr.f32.gmra.mrb[12].mxu1 %v298_v60  ;;  %v300_v2 = vmax.f32 %v282_v63, 0.0  ;;  %v3537_v21 = vpack.c.bf16 %v678_v20, %v677_v19  ;;  %v3553_v19 = vpack.c.bf16 %v854_v17, %v853_v16  ;;  %v856_v20 = vld [vmem:[#allocation4 + $0x140] sm:$0xff] }
 0x14d   :  { %v299_v3 = vmax.f32 %v277_v1, 0.0 }
 0x14e   :  { %3538 = vmatprep.subr.bf16.mxu1 %v3537_v21  ;;  %3554 = vmatprep.subr.bf16.mxu0 %v3553_v19 }
 0x14f   :  { %2866 = vmatprep.mubr.f32.mxu1 %v299_v3  ;;  %3540 = vmatpush3.bf16.msra.mxu1 %v3537_v21  ;;  %v3557_v21 = vpack.c.bf16 %v856_v20, %v855_v18 }
 0x150   :  { %2867 = vmatmul.mubr.f32.gmra.mrb[14].mxu1 %v300_v2  ;;  %3542 = vmatprep.subr.bf16.mxu1 %v3541_v24 }
 0x153   :  { %3544 = vmatpush3.bf16.msra.mxu1 %v3541_v24  ;;  %v3561_v24 = vpack.c.bf16 %v858_v23, %v857_v22  ;;  %v867_v22 = vld [vmem:[#allocation4 + $0x560] sm:$0xff] }
 0x154   :  { %3546 = vmatprep.subr.bf16.mxu1 %v3545_v27  ;;  %v868_v23 = vld [vmem:[#allocation4 + $0x5c0] sm:$0xff] }
 0x157   :  { %3548 = vmatpush3.bf16.msra.mxu1 %v3545_v27  ;;  %v3565_v27 = vpack.c.bf16 %v860_v26, %v859_v25  ;;  %v1037_v25 = vld [vmem:[#allocation4 + $0x28] sm:$0xff] }
 0x158   :  { %3550 = vmatprep.subr.bf16.mxu1 %v3549_v15  ;;  %v1038_v26 = vld [vmem:[#allocation4 + $0x88] sm:$0xff] }
 0x15b   :  { %3552 = vmatpush3.bf16.msra.mxu1 %v3549_v15 }
 0x207   :  { %v2847_v29 = vpop.f32.mrb[0].mxu1 }
 0x208   :  { %v396_v30 = vadd.f32 %v2847_v29, %v2365_v28  ;;  %v390_v31 = vpop.f32.mrb[1].mxu1  ;;  %v862_v29 = vld [vmem:[#allocation4 + $0x380] sm:$0xff] }
 0x209   :  { %v391_v32 = vadd.f32 %v2365_v28, %v390_v31  ;;  %v863_v31 = vld [vmem:[#allocation4 + $0x3e0] sm:$0xff] }
 0x20a   :  { %v470_v35 = vmax.f32 %v396_v30, 0.0 }
 0x20b   :  { %v469_v33 = vmax.f32 %v391_v32, 0.0  ;;  %v2850_v34 = vpop.f32.mrb[2].mxu1  ;;  %v864_v32 = vld [vmem:[#allocation4 + $0x440] sm:$0xff] }
 0x20c   :  { %v406_v36 = vadd.f32 %v2850_v34, %v2365_v28  ;;  %v400_v37 = vpop.f32.mrb[3].mxu1  ;;  %v865_v34 = vld [vmem:[#allocation4 + $0x4a0] sm:$0xff] }
 0x20d   :  { %v401_v38 = vadd.f32 %v2365_v28, %v400_v37  ;;  %2901 = vmatprep.mubr.f32.mxu0 %v469_v33  ;;  %v3573_v33 = vpack.c.bf16 %v864_v32, %v863_v31  ;;  %v2366_v37 = vld [vmem:[#allocation6 + $0x2] ss:$0 sm:$0xff]  ;;  %v1041_v31 = vld [vmem:[#allocation4 + $0x1a8] sm:$0xff] }
 0x20e   :  { %v472_v39 = vmax.f32 %v406_v36, 0.0  ;;  %2902 = vmatmul.mubr.f32.vlgmr.msra.gmra.mrb[16].mxu0 %v470_v35  ;;  %v866_v35 = vld [vmem:[#allocation4 + $0x500] sm:$0xff]  ;;  %v1042_v32 = vld [vmem:[#allocation4 + $0x208] sm:$0xff] }
 0x20f   :  { %v471_v40 = vmax.f32 %v401_v38, 0.0  ;;  %v2853_v41 = vpop.f32.mrb[4].mxu1  ;;  %3556 = vmatpush3.bf16.msra.mxu0 %v3553_v19  ;;  %v3577_v36 = vpack.c.bf16 %v866_v35, %v865_v34  ;;  %v1043_v34 = vld [vmem:[#allocation4 + $0x268] sm:$0xff] }
 0x210   :  { %v416_v42 = vadd.f32 %v2853_v41, %v2365_v28  ;;  %v410_v43 = vpop.f32.mrb[5].mxu1  ;;  %3558 = vmatprep.subr.bf16.mxu0 %v3557_v21  ;;  %v1044_v35 = vld [vmem:[#allocation4 + $0x2c8] sm:$0xff] }
 0x211   :  { %v411_v44 = vadd.f32 %v2365_v28, %v410_v43  ;;  %2904 = vmatprep.mubr.f32.mxu0 %v471_v40 }
 0x212   :  { %v474_v45 = vmax.f32 %v416_v42, 0.0  ;;  %2905 = vmatmul.mubr.f32.gmra.mrb[18].mxu0 %v472_v39 }
 0x213   :  { %v473_v46 = vmax.f32 %v411_v44, 0.0  ;;  %v2856_v47 = vpop.f32.mrb[6].mxu1  ;;  %3560 = vmatpush3.bf16.msra.mxu0 %v3557_v21 }
 0x214   :  { %v426_v48 = vadd.f32 %v2856_v47, %v2365_v28  ;;  %v420_v49 = vpop.f32.mrb[7].mxu1  ;;  %3562 = vmatprep.subr.bf16.mxu0 %v3561_v24 }
 0x215   :  { %v421_v50 = vadd.f32 %v2365_v28, %v420_v49  ;;  %2907 = vmatprep.mubr.f32.mxu0 %v473_v46 }
 0x216   :  { %v476_v51 = vmax.f32 %v426_v48, 0.0  ;;  %2908 = vmatmul.mubr.f32.gmra.mrb[20].mxu0 %v474_v45 }
 0x217   :  { %v475_v52 = vmax.f32 %v421_v50, 0.0  ;;  %v2859_v53 = vpop.f32.mrb[8].mxu1  ;;  %3564 = vmatpush3.bf16.msra.mxu0 %v3561_v24  ;;  %v3581_v24 = vpack.c.bf16 %v868_v23, %v867_v22 }
 0x218   :  { %v436_v54 = vadd.f32 %v2859_v53, %v2365_v28  ;;  %v430_v55 = vpop.f32.mrb[9].mxu1  ;;  %3566 = vmatprep.subr.bf16.mxu0 %v3565_v27 }
 0x219   :  { %v431_v56 = vadd.f32 %v2365_v28, %v430_v55  ;;  %2910 = vmatprep.mubr.f32.mxu0 %v475_v52 }
 0x21a   :  { %v478_v57 = vmax.f32 %v436_v54, 0.0  ;;  %2911 = vmatmul.mubr.f32.gmra.mrb[22].mxu0 %v476_v51 }
 0x21b   :  { %v477_v58 = vmax.f32 %v431_v56, 0.0  ;;  %v2862_v59 = vpop.f32.mrb[10].mxu1  ;;  %3568 = vmatpush3.bf16.msra.mxu0 %v3565_v27  ;;  %v1039_v27 = vld [vmem:[#allocation4 + $0xe8] sm:$0xff] }
 0x21c   :  { %v446_v60 = vadd.f32 %v2862_v59, %v2365_v28  ;;  %v440_v61 = vpop.f32.mrb[11].mxu1 }
 0x21d   :  { %v441_v62 = vadd.f32 %v2365_v28, %v440_v61  ;;  %2913 = vmatprep.mubr.f32.mxu0 %v477_v58 }
 0x21e   :  { %v480_v63 = vmax.f32 %v446_v60, 0.0  ;;  %2914 = vmatmul.mubr.f32.gmra.mrb[24].mxu0 %v478_v57 }
 0x21f   :  { %v479_v0 = vmax.f32 %v441_v62, 0.0  ;;  %v2865_v1 = vpop.f32.mrb[12].mxu1 }
 0x220   :  { %v456_v2 = vadd.f32 %v2865_v1, %v2365_v28  ;;  %v450_v3 = vpop.f32.mrb[13].mxu1 }
 0x221   :  { %v451_v4 = vadd.f32 %v2365_v28, %v450_v3  ;;  %2916 = vmatprep.mubr.f32.mxu0 %v479_v0 }
 0x222   :  { %v482_v5 = vmax.f32 %v456_v2, 0.0  ;;  %2917 = vmatmul.mubr.f32.gmra.mrb[26].mxu0 %v480_v63 }
 0x223   :  { %v481_v6 = vmax.f32 %v451_v4, 0.0  ;;  %v2868_v7 = vpop.f32.mrb[14].mxu1 }
 0x224   :  { %v466_v8 = vadd.f32 %v2868_v7, %v2365_v28  ;;  %v460_v9 = vpop.f32.mrb[15].mxu1 }
 0x225   :  { %2919 = vmatprep.mubr.f32.mxu0 %v481_v6  ;;  %v461_v10 = vadd.f32 %v2365_v28, %v460_v9  ;;  %v861_v28 = vld [vmem:[#allocation4 + $0x320] sm:$0xff] }
 0x226   :  { %2920 = vmatmul.mubr.f32.gmra.mrb[28].mxu0 %v482_v5  ;;  %v484_v11 = vmax.f32 %v466_v8, 0.0  ;;  %v3569_v30 = vpack.c.bf16 %v862_v29, %v861_v28  ;;  %v3585_v28 = vpack.c.bf16 %v1038_v26, %v1037_v25  ;;  %v1040_v29 = vld [vmem:[#allocation4 + $0x148] sm:$0xff] }
 0x227   :  { %v483_v12 = vmax.f32 %v461_v10, 0.0 }
 0x228   :  { %3570 = vmatprep.subr.bf16.mxu0 %v3569_v30  ;;  %3586 = vmatprep.subr.bf16.mxu1 %v3585_v28 }
 0x229   :  { %2922 = vmatprep.mubr.f32.mxu0 %v483_v12  ;;  %3572 = vmatpush3.bf16.msra.mxu0 %v3569_v30  ;;  %v3589_v30 = vpack.c.bf16 %v1040_v29, %v1039_v27 }
 0x22a   :  { %2923 = vmatmul.mubr.f32.gmra.mrb[30].mxu0 %v484_v11  ;;  %3574 = vmatprep.subr.bf16.mxu0 %v3573_v33 }
 0x22d   :  { %3576 = vmatpush3.bf16.msra.mxu0 %v3573_v33  ;;  %v3593_v33 = vpack.c.bf16 %v1042_v32, %v1041_v31  ;;  %v1051_v31 = vld [vmem:[#allocation4 + $0x568] sm:$0xff] }
 0x22e   :  { %3578 = vmatprep.subr.bf16.mxu0 %v3577_v36  ;;  %v1052_v32 = vld [vmem:[#allocation4 + $0x5c8] sm:$0xff] }
 0x231   :  { %3580 = vmatpush3.bf16.msra.mxu0 %v3577_v36  ;;  %v3597_v36 = vpack.c.bf16 %v1044_v35, %v1043_v34  ;;  %v1221_v34 = vld [vmem:[#allocation4 + $0x30] sm:$0xff] }
 0x232   :  { %3582 = vmatprep.subr.bf16.mxu0 %v3581_v24  ;;  %v1222_v35 = vld [vmem:[#allocation4 + $0x90] sm:$0xff] }
 0x235   :  { %3584 = vmatpush3.bf16.msra.mxu0 %v3581_v24 }
 0x2e1   :  { %v2903_v38 = vpop.f32.mrb[16].mxu0 }
 0x2e2   :  { %v580_v39 = vadd.f32 %v2903_v38, %v2366_v37  ;;  %v574_v40 = vpop.f32.mrb[17].mxu0  ;;  %v1046_v38 = vld [vmem:[#allocation4 + $0x388] sm:$0xff] }
 0x2e3   :  { %v575_v41 = vadd.f32 %v2366_v37, %v574_v40  ;;  %v1047_v40 = vld [vmem:[#allocation4 + $0x3e8] sm:$0xff] }
 0x2e4   :  { %v654_v44 = vmax.f32 %v580_v39, 0.0 }
 0x2e5   :  { %v653_v42 = vmax.f32 %v575_v41, 0.0  ;;  %v2906_v43 = vpop.f32.mrb[18].mxu0  ;;  %v1048_v41 = vld [vmem:[#allocation4 + $0x448] sm:$0xff] }
 0x2e6   :  { %v590_v45 = vadd.f32 %v2906_v43, %v2366_v37  ;;  %v584_v46 = vpop.f32.mrb[19].mxu0  ;;  %v1049_v43 = vld [vmem:[#allocation4 + $0x4a8] sm:$0xff] }
 0x2e7   :  { %v585_v47 = vadd.f32 %v2366_v37, %v584_v46  ;;  %2957 = vmatprep.mubr.f32.mxu1 %v653_v42  ;;  %v3605_v42 = vpack.c.bf16 %v1048_v41, %v1047_v40  ;;  %v2367_v46 = vld [vmem:[#allocation6 + $0x3] ss:$0 sm:$0xff]  ;;  %v1225_v40 = vld [vmem:[#allocation4 + $0x1b0] sm:$0xff] }
 0x2e8   :  { %2958 = vmatmul.mubr.f32.vlgmr.msra.gmra.mrb[16].mxu1 %v654_v44  ;;  %v656_v50 = vmax.f32 %v590_v45, 0.0  ;;  %v1050_v44 = vld [vmem:[#allocation4 + $0x508] sm:$0xff]  ;;  %v1226_v41 = vld [vmem:[#allocation4 + $0x210] sm:$0xff] }
 0x2e9   :  { %v655_v48 = vmax.f32 %v585_v47, 0.0  ;;  %v2909_v49 = vpop.f32.mrb[20].mxu0  ;;  %3588 = vmatpush3.bf16.msra.mxu1 %v3585_v28  ;;  %v3609_v45 = vpack.c.bf16 %v1050_v44, %v1049_v43  ;;  %v1227_v43 = vld [vmem:[#allocation4 + $0x270] sm:$0xff] }
 0x2ea   :  { %v600_v51 = vadd.f32 %v2909_v49, %v2366_v37  ;;  %v594_v52 = vpop.f32.mrb[21].mxu0  ;;  %3590 = vmatprep.subr.bf16.mxu1 %v3589_v30  ;;  %v1228_v44 = vld [vmem:[#allocation4 + $0x2d0] sm:$0xff] }
 0x2eb   :  { %v595_v53 = vadd.f32 %v2366_v37, %v594_v52  ;;  %2960 = vmatprep.mubr.f32.mxu1 %v655_v48 }
 0x2ec   :  { %v658_v54 = vmax.f32 %v600_v51, 0.0  ;;  %2961 = vmatmul.mubr.f32.gmra.mrb[18].mxu1 %v656_v50 }
 0x2ed   :  { %v657_v55 = vmax.f32 %v595_v53, 0.0  ;;  %v2912_v56 = vpop.f32.mrb[22].mxu0  ;;  %3592 = vmatpush3.bf16.msra.mxu1 %v3589_v30 }
 0x2ee   :  { %v610_v57 = vadd.f32 %v2912_v56, %v2366_v37  ;;  %v604_v58 = vpop.f32.mrb[23].mxu0  ;;  %3594 = vmatprep.subr.bf16.mxu1 %v3593_v33 }
 0x2ef   :  { %v605_v59 = vadd.f32 %v2366_v37, %v604_v58  ;;  %2963 = vmatprep.mubr.f32.mxu1 %v657_v55 }
 0x2f0   :  { %v660_v60 = vmax.f32 %v610_v57, 0.0  ;;  %2964 = vmatmul.mubr.f32.gmra.mrb[20].mxu1 %v658_v54 }
 0x2f1   :  { %v659_v61 = vmax.f32 %v605_v59, 0.0  ;;  %v2915_v62 = vpop.f32.mrb[24].mxu0  ;;  %3596 = vmatpush3.bf16.msra.mxu1 %v3593_v33  ;;  %v3613_v33 = vpack.c.bf16 %v1052_v32, %v1051_v31 }
 0x2f2   :  { %v620_v63 = vadd.f32 %v2915_v62, %v2366_v37  ;;  %v614_v0 = vpop.f32.mrb[25].mxu0  ;;  %3598 = vmatprep.subr.bf16.mxu1 %v3597_v36 }
 0x2f3   :  { %v615_v1 = vadd.f32 %v2366_v37, %v614_v0  ;;  %2966 = vmatprep.mubr.f32.mxu1 %v659_v61 }
 0x2f4   :  { %v662_v2 = vmax.f32 %v620_v63, 0.0  ;;  %2967 = vmatmul.mubr.f32.gmra.mrb[22].mxu1 %v660_v60 }
 0x2f5   :  { %v661_v3 = vmax.f32 %v615_v1, 0.0  ;;  %v2918_v4 = vpop.f32.mrb[26].mxu0  ;;  %3600 = vmatpush3.bf16.msra.mxu1 %v3597_v36  ;;  %v1223_v36 = vld [vmem:[#allocation4 + $0xf0] sm:$0xff] }
 0x2f6   :  { %v630_v5 = vadd.f32 %v2918_v4, %v2366_v37  ;;  %v624_v6 = vpop.f32.mrb[27].mxu0 }
 0x2f7   :  { %v625_v7 = vadd.f32 %v2366_v37, %v624_v6  ;;  %2969 = vmatprep.mubr.f32.mxu1 %v661_v3 }
 0x2f8   :  { %v664_v8 = vmax.f32 %v630_v5, 0.0  ;;  %2970 = vmatmul.mubr.f32.gmra.mrb[24].mxu1 %v662_v2 }
 0x2f9   :  { %v663_v9 = vmax.f32 %v625_v7, 0.0  ;;  %v2921_v10 = vpop.f32.mrb[28].mxu0 }
 0x2fa   :  { %v640_v11 = vadd.f32 %v2921_v10, %v2366_v37  ;;  %v634_v12 = vpop.f32.mrb[29].mxu0 }
 0x2fb   :  { %v635_v13 = vadd.f32 %v2366_v37, %v634_v12  ;;  %2972 = vmatprep.mubr.f32.mxu1 %v663_v9 }
 0x2fc   :  { %v666_v14 = vmax.f32 %v640_v11, 0.0  ;;  %2973 = vmatmul.mubr.f32.gmra.mrb[26].mxu1 %v664_v8 }
 0x2fd   :  { %v665_v15 = vmax.f32 %v635_v13, 0.0  ;;  %v2924_v16 = vpop.f32.mrb[30].mxu0 }
 0x2fe   :  { %v650_v17 = vadd.f32 %v2924_v16, %v2366_v37  ;;  %v644_v18 = vpop.f32.mrb[31].mxu0 }
 0x2ff   :  { %2975 = vmatprep.mubr.f32.mxu1 %v665_v15  ;;  %v645_v19 = vadd.f32 %v2366_v37, %v644_v18  ;;  %v1045_v37 = vld [vmem:[#allocation4 + $0x328] sm:$0xff] }
 0x300   :  { %2976 = vmatmul.mubr.f32.gmra.mrb[28].mxu1 %v666_v14  ;;  %v668_v20 = vmax.f32 %v650_v17, 0.0  ;;  %v3601_v39 = vpack.c.bf16 %v1046_v38, %v1045_v37  ;;  %v3617_v37 = vpack.c.bf16 %v1222_v35, %v1221_v34  ;;  %v1224_v38 = vld [vmem:[#allocation4 + $0x150] sm:$0xff] }
 0x301   :  { %v667_v21 = vmax.f32 %v645_v19, 0.0 }
 0x302   :  { %3602 = vmatprep.subr.bf16.mxu1 %v3601_v39  ;;  %3618 = vmatprep.subr.bf16.mxu0 %v3617_v37 }
 0x303   :  { %2978 = vmatprep.mubr.f32.mxu1 %v667_v21  ;;  %3604 = vmatpush3.bf16.msra.mxu1 %v3601_v39  ;;  %v3621_v39 = vpack.c.bf16 %v1224_v38, %v1223_v36 }
 0x304   :  { %2979 = vmatmul.mubr.f32.gmra.mrb[30].mxu1 %v668_v20  ;;  %3606 = vmatprep.subr.bf16.mxu1 %v3605_v42 }
 0x307   :  { %3608 = vmatpush3.bf16.msra.mxu1 %v3605_v42  ;;  %v3625_v42 = vpack.c.bf16 %v1226_v41, %v1225_v40  ;;  %v1235_v40 = vld [vmem:[#allocation4 + $0x570] sm:$0xff] }
 0x308   :  { %3610 = vmatprep.subr.bf16.mxu1 %v3609_v45  ;;  %v1236_v41 = vld [vmem:[#allocation4 + $0x5d0] sm:$0xff] }
 0x30b   :  { %3612 = vmatpush3.bf16.msra.mxu1 %v3609_v45  ;;  %v3629_v45 = vpack.c.bf16 %v1228_v44, %v1227_v43  ;;  %v1405_v43 = vld [vmem:[#allocation4 + $0x38] sm:$0xff] }
 0x30c   :  { %3614 = vmatprep.subr.bf16.mxu1 %v3613_v33  ;;  %v1406_v44 = vld [vmem:[#allocation4 + $0x98] sm:$0xff] }
 0x30f   :  { %3616 = vmatpush3.bf16.msra.mxu1 %v3613_v33 }
 0x3bb   :  { %v2959_v47 = vpop.f32.mrb[16].mxu1 }
 0x3bc   :  { %v764_v48 = vadd.f32 %v2959_v47, %v2367_v46  ;;  %v758_v49 = vpop.f32.mrb[17].mxu1  ;;  %v1230_v47 = vld [vmem:[#allocation4 + $0x390] sm:$0xff] }
 0x3bd   :  { %v759_v50 = vadd.f32 %v2367_v46, %v758_v49  ;;  %v1231_v49 = vld [vmem:[#allocation4 + $0x3f0] sm:$0xff] }
 0x3be   :  { %v838_v53 = vmax.f32 %v764_v48, 0.0 }
 0x3bf   :  { %v837_v51 = vmax.f32 %v759_v50, 0.0  ;;  %v2962_v52 = vpop.f32.mrb[18].mxu1  ;;  %v1232_v50 = vld [vmem:[#allocation4 + $0x450] sm:$0xff] }
 0x3c0   :  { %v774_v54 = vadd.f32 %v2962_v52, %v2367_v46  ;;  %v768_v55 = vpop.f32.mrb[19].mxu1  ;;  %v1233_v52 = vld [vmem:[#allocation4 + $0x4b0] sm:$0xff] }
 0x3c1   :  { %v769_v56 = vadd.f32 %v2367_v46, %v768_v55  ;;  %3013 = vmatprep.mubr.f32.mxu0 %v837_v51  ;;  %v3637_v51 = vpack.c.bf16 %v1232_v50, %v1231_v49  ;;  %v2368_v55 = vld [vmem:[#allocation6 + $0x4] ss:$0 sm:$0xff]  ;;  %v1409_v49 = vld [vmem:[#allocation4 + $0x1b8] sm:$0xff] }
 0x3c2   :  { %3014 = vmatmul.mubr.f32.vlgmr.msra.gmra.mrb[32].mxu0 %v838_v53  ;;  %v840_v59 = vmax.f32 %v774_v54, 0.0  ;;  %v1234_v53 = vld [vmem:[#allocation4 + $0x510] sm:$0xff]  ;;  %v1410_v50 = vld [vmem:[#allocation4 + $0x218] sm:$0xff] }
 0x3c3   :  { %v839_v57 = vmax.f32 %v769_v56, 0.0  ;;  %v2965_v58 = vpop.f32.mrb[20].mxu1  ;;  %3620 = vmatpush3.bf16.msra.mxu0 %v3617_v37  ;;  %v3641_v54 = vpack.c.bf16 %v1234_v53, %v1233_v52  ;;  %v1411_v52 = vld [vmem:[#allocation4 + $0x278] sm:$0xff] }
 0x3c4   :  { %v784_v60 = vadd.f32 %v2965_v58, %v2367_v46  ;;  %v778_v61 = vpop.f32.mrb[21].mxu1  ;;  %3622 = vmatprep.subr.bf16.mxu0 %v3621_v39  ;;  %v1412_v53 = vld [vmem:[#allocation4 + $0x2d8] sm:$0xff] }
 0x3c5   :  { %v779_v62 = vadd.f32 %v2367_v46, %v778_v61  ;;  %3016 = vmatprep.mubr.f32.mxu0 %v839_v57 }
 0x3c6   :  { %v842_v63 = vmax.f32 %v784_v60, 0.0  ;;  %3017 = vmatmul.mubr.f32.gmra.mrb[34].mxu0 %v840_v59 }
 0x3c7   :  { %v841_v0 = vmax.f32 %v779_v62, 0.0  ;;  %v2968_v1 = vpop.f32.mrb[22].mxu1  ;;  %3624 = vmatpush3.bf16.msra.mxu0 %v3621_v39 }
 0x3c8   :  { %v794_v2 = vadd.f32 %v2968_v1, %v2367_v46  ;;  %v788_v3 = vpop.f32.mrb[23].mxu1  ;;  %3626 = vmatprep.subr.bf16.mxu0 %v3625_v42 }
 0x3c9   :  { %v789_v4 = vadd.f32 %v2367_v46, %v788_v3  ;;  %3019 = vmatprep.mubr.f32.mxu0 %v841_v0 }
 0x3ca   :  { %v844_v5 = vmax.f32 %v794_v2, 0.0  ;;  %3020 = vmatmul.mubr.f32.gmra.mrb[36].mxu0 %v842_v63 }
 0x3cb   :  { %v843_v6 = vmax.f32 %v789_v4, 0.0  ;;  %v2971_v7 = vpop.f32.mrb[24].mxu1  ;;  %3628 = vmatpush3.bf16.msra.mxu0 %v3625_v42  ;;  %v3645_v42 = vpack.c.bf16 %v1236_v41, %v1235_v40 }
 0x3cc   :  { %v804_v8 = vadd.f32 %v2971_v7, %v2367_v46  ;;  %v798_v9 = vpop.f32.mrb[25].mxu1  ;;  %3630 = vmatprep.subr.bf16.mxu0 %v3629_v45 }
 0x3cd   :  { %v799_v10 = vadd.f32 %v2367_v46, %v798_v9  ;;  %3022 = vmatprep.mubr.f32.mxu0 %v843_v6 }
 0x3ce   :  { %v846_v11 = vmax.f32 %v804_v8, 0.0  ;;  %3023 = vmatmul.mubr.f32.gmra.mrb[38].mxu0 %v844_v5 }
 0x3cf   :  { %v845_v12 = vmax.f32 %v799_v10, 0.0  ;;  %v2974_v13 = vpop.f32.mrb[26].mxu1  ;;  %3632 = vmatpush3.bf16.msra.mxu0 %v3629_v45  ;;  %v1407_v45 = vld [vmem:[#allocation4 + $0xf8] sm:$0xff] }
 0x3d0   :  { %v814_v14 = vadd.f32 %v2974_v13, %v2367_v46  ;;  %v808_v15 = vpop.f32.mrb[27].mxu1 }
 0x3d1   :  { %v809_v16 = vadd.f32 %v2367_v46, %v808_v15  ;;  %3025 = vmatprep.mubr.f32.mxu0 %v845_v12 }
 0x3d2   :  { %v848_v17 = vmax.f32 %v814_v14, 0.0  ;;  %3026 = vmatmul.mubr.f32.gmra.mrb[40].mxu0 %v846_v11 }
 0x3d3   :  { %v847_v18 = vmax.f32 %v809_v16, 0.0  ;;  %v2977_v19 = vpop.f32.mrb[28].mxu1 }
 0x3d4   :  { %v824_v20 = vadd.f32 %v2977_v19, %v2367_v46  ;;  %v818_v21 = vpop.f32.mrb[29].mxu1 }
 0x3d5   :  { %v819_v22 = vadd.f32 %v2367_v46, %v818_v21  ;;  %3028 = vmatprep.mubr.f32.mxu0 %v847_v18 }
 0x3d6   :  { %v850_v23 = vmax.f32 %v824_v20, 0.0  ;;  %3029 = vmatmul.mubr.f32.gmra.mrb[42].mxu0 %v848_v17 }
 0x3d7   :  { %v849_v24 = vmax.f32 %v819_v22, 0.0  ;;  %v2980_v25 = vpop.f32.mrb[30].mxu1 }
 0x3d8   :  { %v834_v26 = vadd.f32 %v2980_v25, %v2367_v46  ;;  %v828_v27 = vpop.f32.mrb[31].mxu1 }
 0x3d9   :  { %3031 = vmatprep.mubr.f32.mxu0 %v849_v24  ;;  %v829_v28 = vadd.f32 %v2367_v46, %v828_v27  ;;  %v1229_v46 = vld [vmem:[#allocation4 + $0x330] sm:$0xff] }
 0x3da   :  { %3032 = vmatmul.mubr.f32.gmra.mrb[44].mxu0 %v850_v23  ;;  %v852_v29 = vmax.f32 %v834_v26, 0.0  ;;  %v3633_v48 = vpack.c.bf16 %v1230_v47, %v1229_v46  ;;  %v3649_v46 = vpack.c.bf16 %v1406_v44, %v1405_v43  ;;  %v1408_v47 = vld [vmem:[#allocation4 + $0x158] sm:$0xff] }
 0x3db   :  { %v851_v30 = vmax.f32 %v829_v28, 0.0 }
 0x3dc   :  { %3634 = vmatprep.subr.bf16.mxu0 %v3633_v48  ;;  %3650 = vmatprep.subr.bf16.mxu1 %v3649_v46 }
 0x3dd   :  { %3034 = vmatprep.mubr.f32.mxu0 %v851_v30  ;;  %3636 = vmatpush3.bf16.msra.mxu0 %v3633_v48  ;;  %v3653_v48 = vpack.c.bf16 %v1408_v47, %v1407_v45 }
 0x3de   :  { %3035 = vmatmul.mubr.f32.gmra.mrb[46].mxu0 %v852_v29  ;;  %3638 = vmatprep.subr.bf16.mxu0 %v3637_v51 }
 0x3e1   :  { %3640 = vmatpush3.bf16.msra.mxu0 %v3637_v51  ;;  %v3657_v51 = vpack.c.bf16 %v1410_v50, %v1409_v49  ;;  %v1419_v49 = vld [vmem:[#allocation4 + $0x578] sm:$0xff] }
 0x3e2   :  { %3642 = vmatprep.subr.bf16.mxu0 %v3641_v54  ;;  %v1420_v50 = vld [vmem:[#allocation4 + $0x5d8] sm:$0xff] }
 0x3e5   :  { %3644 = vmatpush3.bf16.msra.mxu0 %v3641_v54  ;;  %v3661_v54 = vpack.c.bf16 %v1412_v53, %v1411_v52  ;;  %v1589_v52 = vld [vmem:[#allocation4 + $0x40] sm:$0xff] }
 0x3e6   :  { %3646 = vmatprep.subr.bf16.mxu0 %v3645_v42  ;;  %v1590_v53 = vld [vmem:[#allocation4 + $0xa0] sm:$0xff] }
 0x3e9   :  { %3648 = vmatpush3.bf16.msra.mxu0 %v3645_v42 }
 0x495   :  { %v3015_v56 = vpop.f32.mrb[32].mxu0 }
 0x496   :  { %v948_v57 = vadd.f32 %v3015_v56, %v2368_v55  ;;  %v942_v58 = vpop.f32.mrb[33].mxu0  ;;  %v1414_v56 = vld [vmem:[#allocation4 + $0x398] sm:$0xff] }
 0x497   :  { %v943_v59 = vadd.f32 %v2368_v55, %v942_v58  ;;  %v1415_v58 = vld [vmem:[#allocation4 + $0x3f8] sm:$0xff] }
 0x498   :  { %v1022_v62 = vmax.f32 %v948_v57, 0.0 }
 0x499   :  { %v1021_v60 = vmax.f32 %v943_v59, 0.0  ;;  %v3018_v61 = vpop.f32.mrb[34].mxu0  ;;  %v1416_v59 = vld [vmem:[#allocation4 + $0x458] sm:$0xff] }
 0x49a   :  { %v958_v63 = vadd.f32 %v3018_v61, %v2368_v55  ;;  %v952_v0 = vpop.f32.mrb[35].mxu0  ;;  %v1417_v61 = vld [vmem:[#allocation4 + $0x4b8] sm:$0xff] }
 0x49b   :  { %v953_v1 = vadd.f32 %v2368_v55, %v952_v0  ;;  %3069 = vmatprep.mubr.f32.mxu1 %v1021_v60  ;;  %v3669_v60 = vpack.c.bf16 %v1416_v59, %v1415_v58  ;;  %v2369_v0 = vld [vmem:[#allocation6 + $0x5] ss:$0 sm:$0xff] }
 0x49c   :  { %3070 = vmatmul.mubr.f32.vlgmr.msra.gmra.mrb[32].mxu1 %v1022_v62  ;;  %v1024_v4 = vmax.f32 %v958_v63, 0.0  ;;  %v1418_v62 = vld [vmem:[#allocation4 + $0x518] sm:$0xff]  ;;  %v1593_v58 = vld [vmem:[#allocation4 + $0x1c0] sm:$0xff] }
 0x49d   :  { %v1023_v2 = vmax.f32 %v953_v1, 0.0  ;;  %v3021_v3 = vpop.f32.mrb[36].mxu0  ;;  %3652 = vmatpush3.bf16.msra.mxu1 %v3649_v46  ;;  %v3673_v63 = vpack.c.bf16 %v1418_v62, %v1417_v61  ;;  %v1594_v59 = vld [vmem:[#allocation4 + $0x220] sm:$0xff] }
 0x49e   :  { %v968_v5 = vadd.f32 %v3021_v3, %v2368_v55  ;;  %v962_v6 = vpop.f32.mrb[37].mxu0  ;;  %3654 = vmatprep.subr.bf16.mxu1 %v3653_v48  ;;  %v1595_v61 = vld [vmem:[#allocation4 + $0x280] sm:$0xff] }
 0x49f   :  { %v963_v7 = vadd.f32 %v2368_v55, %v962_v6  ;;  %3072 = vmatprep.mubr.f32.mxu1 %v1023_v2  ;;  %v1596_v62 = vld [vmem:[#allocation4 + $0x2e0] sm:$0xff] }
 0x4a0   :  { %3073 = vmatmul.mubr.f32.gmra.mrb[34].mxu1 %v1024_v4  ;;  %v1026_v10 = vmax.f32 %v968_v5, 0.0 }
 0x4a1   :  { %v1025_v8 = vmax.f32 %v963_v7, 0.0  ;;  %v3024_v9 = vpop.f32.mrb[38].mxu0  ;;  %3656 = vmatpush3.bf16.msra.mxu1 %v3653_v48 }
 0x4a2   :  { %v978_v11 = vadd.f32 %v3024_v9, %v2368_v55  ;;  %v972_v12 = vpop.f32.mrb[39].mxu0  ;;  %3658 = vmatprep.subr.bf16.mxu1 %v3657_v51 }
 0x4a3   :  { %v973_v13 = vadd.f32 %v2368_v55, %v972_v12  ;;  %3075 = vmatprep.mubr.f32.mxu1 %v1025_v8 }
 0x4a4   :  { %v1028_v14 = vmax.f32 %v978_v11, 0.0  ;;  %3076 = vmatmul.mubr.f32.gmra.mrb[36].mxu1 %v1026_v10 }
 0x4a5   :  { %v1027_v15 = vmax.f32 %v973_v13, 0.0  ;;  %v3027_v16 = vpop.f32.mrb[40].mxu0  ;;  %3660 = vmatpush3.bf16.msra.mxu1 %v3657_v51  ;;  %v3677_v51 = vpack.c.bf16 %v1420_v50, %v1419_v49 }
 0x4a6   :  { %v988_v17 = vadd.f32 %v3027_v16, %v2368_v55  ;;  %v982_v18 = vpop.f32.mrb[41].mxu0  ;;  %3662 = vmatprep.subr.bf16.mxu1 %v3661_v54 }
 0x4a7   :  { %v983_v19 = vadd.f32 %v2368_v55, %v982_v18  ;;  %3078 = vmatprep.mubr.f32.mxu1 %v1027_v15 }
 0x4a8   :  { %v1030_v20 = vmax.f32 %v988_v17, 0.0  ;;  %3079 = vmatmul.mubr.f32.gmra.mrb[38].mxu1 %v1028_v14 }
 0x4a9   :  { %v1029_v21 = vmax.f32 %v983_v19, 0.0  ;;  %v3030_v22 = vpop.f32.mrb[42].mxu0  ;;  %3664 = vmatpush3.bf16.msra.mxu1 %v3661_v54  ;;  %v1591_v54 = vld [vmem:[#allocation4 + $0x100] sm:$0xff] }
 0x4aa   :  { %v998_v23 = vadd.f32 %v3030_v22, %v2368_v55  ;;  %v992_v24 = vpop.f32.mrb[43].mxu0 }
 0x4ab   :  { %v993_v25 = vadd.f32 %v2368_v55, %v992_v24  ;;  %3081 = vmatprep.mubr.f32.mxu1 %v1029_v21 }
 0x4ac   :  { %v1032_v26 = vmax.f32 %v998_v23, 0.0  ;;  %3082 = vmatmul.mubr.f32.gmra.mrb[40].mxu1 %v1030_v20 }
 0x4ad   :  { %v1031_v27 = vmax.f32 %v993_v25, 0.0  ;;  %v3033_v28 = vpop.f32.mrb[44].mxu0 }
 0x4ae   :  { %v1008_v29 = vadd.f32 %v3033_v28, %v2368_v55  ;;  %v1002_v30 = vpop.f32.mrb[45].mxu0 }
 0x4af   :  { %v1003_v31 = vadd.f32 %v2368_v55, %v1002_v30  ;;  %3084 = vmatprep.mubr.f32.mxu1 %v1031_v27 }
 0x4b0   :  { %v1034_v32 = vmax.f32 %v1008_v29, 0.0  ;;  %3085 = vmatmul.mubr.f32.gmra.mrb[42].mxu1 %v1032_v26 }
 0x4b1   :  { %v1033_v33 = vmax.f32 %v1003_v31, 0.0  ;;  %v3036_v34 = vpop.f32.mrb[46].mxu0 }
 0x4b2   :  { %v1018_v35 = vadd.f32 %v3036_v34, %v2368_v55  ;;  %v1012_v36 = vpop.f32.mrb[47].mxu0 }
 0x4b3   :  { %3087 = vmatprep.mubr.f32.mxu1 %v1033_v33  ;;  %v1013_v37 = vadd.f32 %v2368_v55, %v1012_v36  ;;  %v1413_v55 = vld [vmem:[#allocation4 + $0x338] sm:$0xff] }
 0x4b4   :  { %3088 = vmatmul.mubr.f32.gmra.mrb[44].mxu1 %v1034_v32  ;;  %v1036_v38 = vmax.f32 %v1018_v35, 0.0  ;;  %v3665_v57 = vpack.c.bf16 %v1414_v56, %v1413_v55  ;;  %v3681_v55 = vpack.c.bf16 %v1590_v53, %v1589_v52  ;;  %v1592_v56 = vld [vmem:[#allocation4 + $0x160] sm:$0xff] }
 0x4b5   :  { %v1035_v39 = vmax.f32 %v1013_v37, 0.0 }
 0x4b6   :  { %3666 = vmatprep.subr.bf16.mxu1 %v3665_v57  ;;  %3682 = vmatprep.subr.bf16.mxu0 %v3681_v55 }
 0x4b7   :  { %3090 = vmatprep.mubr.f32.mxu1 %v1035_v39  ;;  %3668 = vmatpush3.bf16.msra.mxu1 %v3665_v57  ;;  %v3685_v57 = vpack.c.bf16 %v1592_v56, %v1591_v54 }
 0x4b8   :  { %3091 = vmatmul.mubr.f32.gmra.mrb[46].mxu1 %v1036_v38  ;;  %3670 = vmatprep.subr.bf16.mxu1 %v3669_v60 }
 0x4bb   :  { %3672 = vmatpush3.bf16.msra.mxu1 %v3669_v60  ;;  %v3689_v60 = vpack.c.bf16 %v1594_v59, %v1593_v58  ;;  %v1603_v58 = vld [vmem:[#allocation4 + $0x580] sm:$0xff] }
 0x4bc   :  { %3674 = vmatprep.subr.bf16.mxu1 %v3673_v63  ;;  %v1604_v59 = vld [vmem:[#allocation4 + $0x5e0] sm:$0xff] }
 0x4bf   :  { %3676 = vmatpush3.bf16.msra.mxu1 %v3673_v63  ;;  %v3693_v63 = vpack.c.bf16 %v1596_v62, %v1595_v61  ;;  %v1773_v61 = vld [vmem:[#allocation4 + $0x48] sm:$0xff] }
 0x4c0   :  { %3678 = vmatprep.subr.bf16.mxu1 %v3677_v51  ;;  %v1774_v62 = vld [vmem:[#allocation4 + $0xa8] sm:$0xff] }
 0x4c3   :  { %3680 = vmatpush3.bf16.msra.mxu1 %v3677_v51 }
 0x56f   :  { %v3071_v1 = vpop.f32.mrb[32].mxu1 }
 0x570   :  { %v1132_v2 = vadd.f32 %v3071_v1, %v2369_v0  ;;  %v1126_v3 = vpop.f32.mrb[33].mxu1  ;;  %v1598_v1 = vld [vmem:[#allocation4 + $0x3a0] sm:$0xff] }
 0x571   :  { %v1127_v4 = vadd.f32 %v2369_v0, %v1126_v3  ;;  %v1599_v3 = vld [vmem:[#allocation4 + $0x400] sm:$0xff] }
 0x572   :  { %v1206_v7 = vmax.f32 %v1132_v2, 0.0 }
 0x573   :  { %v1205_v5 = vmax.f32 %v1127_v4, 0.0  ;;  %v3074_v6 = vpop.f32.mrb[34].mxu1  ;;  %v1600_v4 = vld [vmem:[#allocation4 + $0x460] sm:$0xff] }
 0x574   :  { %v1142_v8 = vadd.f32 %v3074_v6, %v2369_v0  ;;  %v1136_v9 = vpop.f32.mrb[35].mxu1  ;;  %v1601_v6 = vld [vmem:[#allocation4 + $0x4c0] sm:$0xff] }
 0x575   :  { %v1137_v10 = vadd.f32 %v2369_v0, %v1136_v9  ;;  %3125 = vmatprep.mubr.f32.mxu0 %v1205_v5  ;;  %v3701_v5 = vpack.c.bf16 %v1600_v4, %v1599_v3  ;;  %v2370_v9 = vld [vmem:[#allocation6 + $0x6] ss:$0 sm:$0xff]  ;;  %v1777_v3 = vld [vmem:[#allocation4 + $0x1c8] sm:$0xff] }
 0x576   :  { %3126 = vmatmul.mubr.f32.vlgmr.msra.gmra.mrb[48].mxu0 %v1206_v7  ;;  %v1208_v13 = vmax.f32 %v1142_v8, 0.0  ;;  %v1602_v7 = vld [vmem:[#allocation4 + $0x520] sm:$0xff]  ;;  %v1778_v4 = vld [vmem:[#allocation4 + $0x228] sm:$0xff] }
 0x577   :  { %v1207_v11 = vmax.f32 %v1137_v10, 0.0  ;;  %v3077_v12 = vpop.f32.mrb[36].mxu1  ;;  %3684 = vmatpush3.bf16.msra.mxu0 %v3681_v55  ;;  %v3705_v8 = vpack.c.bf16 %v1602_v7, %v1601_v6  ;;  %v1779_v6 = vld [vmem:[#allocation4 + $0x288] sm:$0xff] }
 0x578   :  { %v1152_v14 = vadd.f32 %v3077_v12, %v2369_v0  ;;  %v1146_v15 = vpop.f32.mrb[37].mxu1  ;;  %3686 = vmatprep.subr.bf16.mxu0 %v3685_v57  ;;  %v1780_v7 = vld [vmem:[#allocation4 + $0x2e8] sm:$0xff] }
 0x579   :  { %v1147_v16 = vadd.f32 %v2369_v0, %v1146_v15  ;;  %3128 = vmatprep.mubr.f32.mxu0 %v1207_v11 }
 0x57a   :  { %3129 = vmatmul.mubr.f32.gmra.mrb[50].mxu0 %v1208_v13  ;;  %v1210_v19 = vmax.f32 %v1152_v14, 0.0 }
 0x57b   :  { %v1209_v17 = vmax.f32 %v1147_v16, 0.0  ;;  %v3080_v18 = vpop.f32.mrb[38].mxu1  ;;  %3688 = vmatpush3.bf16.msra.mxu0 %v3685_v57 }
 0x57c   :  { %v1162_v20 = vadd.f32 %v3080_v18, %v2369_v0  ;;  %v1156_v21 = vpop.f32.mrb[39].mxu1  ;;  %3690 = vmatprep.subr.bf16.mxu0 %v3689_v60 }
 0x57d   :  { %v1157_v22 = vadd.f32 %v2369_v0, %v1156_v21  ;;  %3131 = vmatprep.mubr.f32.mxu0 %v1209_v17 }
 0x57e   :  { %v1212_v23 = vmax.f32 %v1162_v20, 0.0  ;;  %3132 = vmatmul.mubr.f32.gmra.mrb[52].mxu0 %v1210_v19 }
 0x57f   :  { %v1211_v24 = vmax.f32 %v1157_v22, 0.0  ;;  %v3083_v25 = vpop.f32.mrb[40].mxu1  ;;  %3692 = vmatpush3.bf16.msra.mxu0 %v3689_v60  ;;  %v3709_v60 = vpack.c.bf16 %v1604_v59, %v1603_v58 }
 0x580   :  { %v1172_v26 = vadd.f32 %v3083_v25, %v2369_v0  ;;  %v1166_v27 = vpop.f32.mrb[41].mxu1  ;;  %3694 = vmatprep.subr.bf16.mxu0 %v3693_v63 }
 0x581   :  { %v1167_v28 = vadd.f32 %v2369_v0, %v1166_v27  ;;  %3134 = vmatprep.mubr.f32.mxu0 %v1211_v24 }
 0x582   :  { %v1214_v29 = vmax.f32 %v1172_v26, 0.0  ;;  %3135 = vmatmul.mubr.f32.gmra.mrb[54].mxu0 %v1212_v23 }
 0x583   :  { %v1213_v30 = vmax.f32 %v1167_v28, 0.0  ;;  %v3086_v31 = vpop.f32.mrb[42].mxu1  ;;  %3696 = vmatpush3.bf16.msra.mxu0 %v3693_v63  ;;  %v1775_v63 = vld [vmem:[#allocation4 + $0x108] sm:$0xff] }
 0x584   :  { %v1182_v32 = vadd.f32 %v3086_v31, %v2369_v0  ;;  %v1176_v33 = vpop.f32.mrb[43].mxu1 }
 0x585   :  { %v1177_v34 = vadd.f32 %v2369_v0, %v1176_v33  ;;  %3137 = vmatprep.mubr.f32.mxu0 %v1213_v30 }
 0x586   :  { %v1216_v35 = vmax.f32 %v1182_v32, 0.0  ;;  %3138 = vmatmul.mubr.f32.gmra.mrb[56].mxu0 %v1214_v29 }
 0x587   :  { %v1215_v36 = vmax.f32 %v1177_v34, 0.0  ;;  %v3089_v37 = vpop.f32.mrb[44].mxu1 }
 0x588   :  { %v1192_v38 = vadd.f32 %v3089_v37, %v2369_v0  ;;  %v1186_v39 = vpop.f32.mrb[45].mxu1 }
 0x589   :  { %v1187_v40 = vadd.f32 %v2369_v0, %v1186_v39  ;;  %3140 = vmatprep.mubr.f32.mxu0 %v1215_v36 }
 0x58a   :  { %v1218_v41 = vmax.f32 %v1192_v38, 0.0  ;;  %3141 = vmatmul.mubr.f32.gmra.mrb[58].mxu0 %v1216_v35 }
 0x58b   :  { %v1217_v42 = vmax.f32 %v1187_v40, 0.0  ;;  %v3092_v43 = vpop.f32.mrb[46].mxu1 }
 0x58c   :  { %v1202_v44 = vadd.f32 %v3092_v43, %v2369_v0  ;;  %v1196_v45 = vpop.f32.mrb[47].mxu1 }
 0x58d   :  { %3143 = vmatprep.mubr.f32.mxu0 %v1217_v42  ;;  %v1197_v46 = vadd.f32 %v2369_v0, %v1196_v45  ;;  %v1597_v0 = vld [vmem:[#allocation4 + $0x340] sm:$0xff] }
 0x58e   :  { %3144 = vmatmul.mubr.f32.gmra.mrb[60].mxu0 %v1218_v41  ;;  %v1220_v47 = vmax.f32 %v1202_v44, 0.0  ;;  %v3697_v2 = vpack.c.bf16 %v1598_v1, %v1597_v0  ;;  %v3713_v0 = vpack.c.bf16 %v1774_v62, %v1773_v61  ;;  %v1776_v1 = vld [vmem:[#allocation4 + $0x168] sm:$0xff] }
 0x58f   :  { %v1219_v48 = vmax.f32 %v1197_v46, 0.0 }
 0x590   :  { %3698 = vmatprep.subr.bf16.mxu0 %v3697_v2  ;;  %3714 = vmatprep.subr.bf16.mxu1 %v3713_v0 }
 0x591   :  { %3146 = vmatprep.mubr.f32.mxu0 %v1219_v48  ;;  %3700 = vmatpush3.bf16.msra.mxu0 %v3697_v2  ;;  %v3717_v2 = vpack.c.bf16 %v1776_v1, %v1775_v63 }
 0x592   :  { %3147 = vmatmul.mubr.f32.gmra.mrb[62].mxu0 %v1220_v47  ;;  %3702 = vmatprep.subr.bf16.mxu0 %v3701_v5 }
 0x595   :  { %3704 = vmatpush3.bf16.msra.mxu0 %v3701_v5  ;;  %v3721_v5 = vpack.c.bf16 %v1778_v4, %v1777_v3  ;;  %v1787_v3 = vld [vmem:[#allocation4 + $0x588] sm:$0xff] }
 0x596   :  { %3706 = vmatprep.subr.bf16.mxu0 %v3705_v8  ;;  %v1788_v4 = vld [vmem:[#allocation4 + $0x5e8] sm:$0xff] }
 0x599   :  { %3708 = vmatpush3.bf16.msra.mxu0 %v3705_v8  ;;  %v3725_v8 = vpack.c.bf16 %v1780_v7, %v1779_v6  ;;  %v1957_v6 = vld [vmem:[#allocation4 + $0x50] sm:$0xff] }
 0x59a   :  { %3710 = vmatprep.subr.bf16.mxu0 %v3709_v60  ;;  %v1958_v7 = vld [vmem:[#allocation4 + $0xb0] sm:$0xff] }
 0x59d   :  { %3712 = vmatpush3.bf16.msra.mxu0 %v3709_v60 }
 0x649   :  { %v3127_v10 = vpop.f32.mrb[48].mxu0 }
 0x64a   :  { %v1316_v11 = vadd.f32 %v3127_v10, %v2370_v9  ;;  %v1310_v12 = vpop.f32.mrb[49].mxu0  ;;  %v1782_v10 = vld [vmem:[#allocation4 + $0x3a8] sm:$0xff] }
 0x64b   :  { %v1311_v13 = vadd.f32 %v2370_v9, %v1310_v12  ;;  %v1783_v12 = vld [vmem:[#allocation4 + $0x408] sm:$0xff] }
 0x64c   :  { %v1390_v16 = vmax.f32 %v1316_v11, 0.0 }
 0x64d   :  { %v1389_v14 = vmax.f32 %v1311_v13, 0.0  ;;  %v3130_v15 = vpop.f32.mrb[50].mxu0  ;;  %v1784_v13 = vld [vmem:[#allocation4 + $0x468] sm:$0xff] }
 0x64e   :  { %v1326_v17 = vadd.f32 %v3130_v15, %v2370_v9  ;;  %v1320_v18 = vpop.f32.mrb[51].mxu0  ;;  %v1785_v15 = vld [vmem:[#allocation4 + $0x4c8] sm:$0xff] }
 0x64f   :  { %v1321_v19 = vadd.f32 %v2370_v9, %v1320_v18  ;;  %3181 = vmatprep.mubr.f32.mxu1 %v1389_v14  ;;  %v3733_v14 = vpack.c.bf16 %v1784_v13, %v1783_v12  ;;  %v2371_v18 = vld [vmem:[#allocation6 + $0x7] ss:$0 sm:$0xff]  ;;  %v1961_v12 = vld [vmem:[#allocation4 + $0x1d0] sm:$0xff] }
 0x650   :  { %3182 = vmatmul.mubr.f32.vlgmr.msra.gmra.mrb[48].mxu1 %v1390_v16  ;;  %v1392_v22 = vmax.f32 %v1326_v17, 0.0  ;;  %v1786_v16 = vld [vmem:[#allocation4 + $0x528] sm:$0xff]  ;;  %v1962_v13 = vld [vmem:[#allocation4 + $0x230] sm:$0xff] }
 0x651   :  { %v1391_v20 = vmax.f32 %v1321_v19, 0.0  ;;  %v3133_v21 = vpop.f32.mrb[52].mxu0  ;;  %3716 = vmatpush3.bf16.msra.mxu1 %v3713_v0  ;;  %v3737_v17 = vpack.c.bf16 %v1786_v16, %v1785_v15  ;;  %v1963_v15 = vld [vmem:[#allocation4 + $0x290] sm:$0xff] }
 0x652   :  { %v1336_v23 = vadd.f32 %v3133_v21, %v2370_v9  ;;  %v1330_v24 = vpop.f32.mrb[53].mxu0  ;;  %3718 = vmatprep.subr.bf16.mxu1 %v3717_v2  ;;  %v1964_v16 = vld [vmem:[#allocation4 + $0x2f0] sm:$0xff] }
 0x653   :  { %v1331_v25 = vadd.f32 %v2370_v9, %v1330_v24  ;;  %3184 = vmatprep.mubr.f32.mxu1 %v1391_v20 }
 0x654   :  { %3185 = vmatmul.mubr.f32.gmra.mrb[50].mxu1 %v1392_v22  ;;  %v1394_v28 = vmax.f32 %v1336_v23, 0.0 }
 0x655   :  { %v1393_v26 = vmax.f32 %v1331_v25, 0.0  ;;  %v3136_v27 = vpop.f32.mrb[54].mxu0  ;;  %3720 = vmatpush3.bf16.msra.mxu1 %v3717_v2 }
 0x656   :  { %v1346_v29 = vadd.f32 %v3136_v27, %v2370_v9  ;;  %v1340_v30 = vpop.f32.mrb[55].mxu0  ;;  %3722 = vmatprep.subr.bf16.mxu1 %v3721_v5 }
 0x657   :  { %v1341_v31 = vadd.f32 %v2370_v9, %v1340_v30  ;;  %3187 = vmatprep.mubr.f32.mxu1 %v1393_v26 }
 0x658   :  { %3188 = vmatmul.mubr.f32.gmra.mrb[52].mxu1 %v1394_v28  ;;  %v1396_v34 = vmax.f32 %v1346_v29, 0.0 }
 0x659   :  { %v1395_v32 = vmax.f32 %v1341_v31, 0.0  ;;  %v3139_v33 = vpop.f32.mrb[56].mxu0  ;;  %3724 = vmatpush3.bf16.msra.mxu1 %v3721_v5  ;;  %v3741_v5 = vpack.c.bf16 %v1788_v4, %v1787_v3 }
 0x65a   :  { %v1356_v35 = vadd.f32 %v3139_v33, %v2370_v9  ;;  %v1350_v36 = vpop.f32.mrb[57].mxu0  ;;  %3726 = vmatprep.subr.bf16.mxu1 %v3725_v8 }
 0x65b   :  { %v1351_v37 = vadd.f32 %v2370_v9, %v1350_v36  ;;  %3190 = vmatprep.mubr.f32.mxu1 %v1395_v32 }
 0x65c   :  { %v1398_v38 = vmax.f32 %v1356_v35, 0.0  ;;  %3191 = vmatmul.mubr.f32.gmra.mrb[54].mxu1 %v1396_v34 }
 0x65d   :  { %v1397_v39 = vmax.f32 %v1351_v37, 0.0  ;;  %v3142_v40 = vpop.f32.mrb[58].mxu0  ;;  %3728 = vmatpush3.bf16.msra.mxu1 %v3725_v8  ;;  %v1959_v8 = vld [vmem:[#allocation4 + $0x110] sm:$0xff] }
 0x65e   :  { %v1366_v41 = vadd.f32 %v3142_v40, %v2370_v9  ;;  %v1360_v42 = vpop.f32.mrb[59].mxu0 }
 0x65f   :  { %v1361_v43 = vadd.f32 %v2370_v9, %v1360_v42  ;;  %3193 = vmatprep.mubr.f32.mxu1 %v1397_v39 }
 0x660   :  { %v1400_v44 = vmax.f32 %v1366_v41, 0.0  ;;  %3194 = vmatmul.mubr.f32.gmra.mrb[56].mxu1 %v1398_v38 }
 0x661   :  { %v1399_v45 = vmax.f32 %v1361_v43, 0.0  ;;  %v3145_v46 = vpop.f32.mrb[60].mxu0 }
 0x662   :  { %v1376_v47 = vadd.f32 %v3145_v46, %v2370_v9  ;;  %v1370_v48 = vpop.f32.mrb[61].mxu0 }
 0x663   :  { %v1371_v49 = vadd.f32 %v2370_v9, %v1370_v48  ;;  %3196 = vmatprep.mubr.f32.mxu1 %v1399_v45 }
 0x664   :  { %v1402_v50 = vmax.f32 %v1376_v47, 0.0  ;;  %3197 = vmatmul.mubr.f32.gmra.mrb[58].mxu1 %v1400_v44 }
 0x665   :  { %v1401_v51 = vmax.f32 %v1371_v49, 0.0  ;;  %v3148_v52 = vpop.f32.mrb[62].mxu0 }
 0x666   :  { %v1386_v53 = vadd.f32 %v3148_v52, %v2370_v9  ;;  %v1380_v54 = vpop.f32.mrb[63].mxu0 }
 0x667   :  { %3199 = vmatprep.mubr.f32.mxu1 %v1401_v51  ;;  %v1381_v55 = vadd.f32 %v2370_v9, %v1380_v54  ;;  %v1781_v9 = vld [vmem:[#allocation4 + $0x348] sm:$0xff] }
 0x668   :  { %3200 = vmatmul.mubr.f32.gmra.mrb[60].mxu1 %v1402_v50  ;;  %v1404_v56 = vmax.f32 %v1386_v53, 0.0  ;;  %v3729_v11 = vpack.c.bf16 %v1782_v10, %v1781_v9  ;;  %v3745_v9 = vpack.c.bf16 %v1958_v7, %v1957_v6  ;;  %v1960_v10 = vld [vmem:[#allocation4 + $0x170] sm:$0xff] }
 0x669   :  { %v1403_v57 = vmax.f32 %v1381_v55, 0.0 }
 0x66a   :  { %3730 = vmatprep.subr.bf16.mxu1 %v3729_v11  ;;  %3746 = vmatprep.subr.bf16.mxu0 %v3745_v9 }
 0x66b   :  { %3202 = vmatprep.mubr.f32.mxu1 %v1403_v57  ;;  %3732 = vmatpush3.bf16.msra.mxu1 %v3729_v11  ;;  %v3749_v11 = vpack.c.bf16 %v1960_v10, %v1959_v8 }
 0x66c   :  { %3203 = vmatmul.mubr.f32.gmra.mrb[62].mxu1 %v1404_v56  ;;  %3734 = vmatprep.subr.bf16.mxu1 %v3733_v14 }
 0x66f   :  { %3736 = vmatpush3.bf16.msra.mxu1 %v3733_v14  ;;  %v3753_v14 = vpack.c.bf16 %v1962_v13, %v1961_v12  ;;  %v1971_v12 = vld [vmem:[#allocation4 + $0x590] sm:$0xff] }
 0x670   :  { %3738 = vmatprep.subr.bf16.mxu1 %v3737_v17  ;;  %v1972_v13 = vld [vmem:[#allocation4 + $0x5f0] sm:$0xff] }
 0x673   :  { %3740 = vmatpush3.bf16.msra.mxu1 %v3737_v17  ;;  %v3757_v17 = vpack.c.bf16 %v1964_v16, %v1963_v15  ;;  %v2141_v15 = vld [vmem:[#allocation4 + $0x58] sm:$0xff] }
 0x674   :  { %3742 = vmatprep.subr.bf16.mxu1 %v3741_v5  ;;  %v2142_v16 = vld [vmem:[#allocation4 + $0xb8] sm:$0xff] }
 0x677   :  { %3744 = vmatpush3.bf16.msra.mxu1 %v3741_v5 }
 0x723   :  { %v3183_v19 = vpop.f32.mrb[48].mxu1 }
 0x724   :  { %v1500_v20 = vadd.f32 %v3183_v19, %v2371_v18  ;;  %v1494_v21 = vpop.f32.mrb[49].mxu1  ;;  %v1966_v19 = vld [vmem:[#allocation4 + $0x3b0] sm:$0xff] }
 0x725   :  { %v1495_v22 = vadd.f32 %v2371_v18, %v1494_v21  ;;  %v1967_v21 = vld [vmem:[#allocation4 + $0x410] sm:$0xff] }
 0x726   :  { %v1574_v25 = vmax.f32 %v1500_v20, 0.0 }
 0x727   :  { %v1573_v23 = vmax.f32 %v1495_v22, 0.0  ;;  %v3186_v24 = vpop.f32.mrb[50].mxu1  ;;  %v1968_v22 = vld [vmem:[#allocation4 + $0x470] sm:$0xff] }
 0x728   :  { %v1510_v26 = vadd.f32 %v3186_v24, %v2371_v18  ;;  %v1504_v27 = vpop.f32.mrb[51].mxu1  ;;  %v1969_v24 = vld [vmem:[#allocation4 + $0x4d0] sm:$0xff] }
 0x729   :  { %v1505_v28 = vadd.f32 %v2371_v18, %v1504_v27  ;;  %3237 = vmatprep.mubr.f32.mxu0 %v1573_v23  ;;  %v3765_v23 = vpack.c.bf16 %v1968_v22, %v1967_v21  ;;  %v2372_v27 = vld [vmem:[#allocation6 + $0x8] ss:$0 sm:$0xff]  ;;  %v2145_v21 = vld [vmem:[#allocation4 + $0x1d8] sm:$0xff] }
 0x72a   :  { %3238 = vmatmul.mubr.f32.vlgmr.msra.gmra.mrb[64].mxu0 %v1574_v25  ;;  %v1576_v31 = vmax.f32 %v1510_v26, 0.0  ;;  %v1970_v25 = vld [vmem:[#allocation4 + $0x530] sm:$0xff]  ;;  %v2146_v22 = vld [vmem:[#allocation4 + $0x238] sm:$0xff] }
 0x72b   :  { %v1575_v29 = vmax.f32 %v1505_v28, 0.0  ;;  %v3189_v30 = vpop.f32.mrb[52].mxu1  ;;  %3748 = vmatpush3.bf16.msra.mxu0 %v3745_v9  ;;  %v3769_v26 = vpack.c.bf16 %v1970_v25, %v1969_v24  ;;  %v2147_v24 = vld [vmem:[#allocation4 + $0x298] sm:$0xff] }
 0x72c   :  { %v1520_v32 = vadd.f32 %v3189_v30, %v2371_v18  ;;  %v1514_v33 = vpop.f32.mrb[53].mxu1  ;;  %3750 = vmatprep.subr.bf16.mxu0 %v3749_v11  ;;  %v2148_v25 = vld [vmem:[#allocation4 + $0x2f8] sm:$0xff] }
 0x72d   :  { %v1515_v34 = vadd.f32 %v2371_v18, %v1514_v33  ;;  %3240 = vmatprep.mubr.f32.mxu0 %v1575_v29 }
 0x72e   :  { %3241 = vmatmul.mubr.f32.gmra.mrb[66].mxu0 %v1576_v31  ;;  %v1578_v37 = vmax.f32 %v1520_v32, 0.0 }
 0x72f   :  { %v1577_v35 = vmax.f32 %v1515_v34, 0.0  ;;  %v3192_v36 = vpop.f32.mrb[54].mxu1  ;;  %3752 = vmatpush3.bf16.msra.mxu0 %v3749_v11 }
 0x730   :  { %v1530_v38 = vadd.f32 %v3192_v36, %v2371_v18  ;;  %v1524_v39 = vpop.f32.mrb[55].mxu1  ;;  %3754 = vmatprep.subr.bf16.mxu0 %v3753_v14 }
 0x731   :  { %v1525_v40 = vadd.f32 %v2371_v18, %v1524_v39  ;;  %3243 = vmatprep.mubr.f32.mxu0 %v1577_v35 }
 0x732   :  { %3244 = vmatmul.mubr.f32.gmra.mrb[68].mxu0 %v1578_v37  ;;  %v1580_v43 = vmax.f32 %v1530_v38, 0.0 }
 0x733   :  { %v1579_v41 = vmax.f32 %v1525_v40, 0.0  ;;  %v3195_v42 = vpop.f32.mrb[56].mxu1  ;;  %3756 = vmatpush3.bf16.msra.mxu0 %v3753_v14  ;;  %v3773_v14 = vpack.c.bf16 %v1972_v13, %v1971_v12 }
 0x734   :  { %v1540_v44 = vadd.f32 %v3195_v42, %v2371_v18  ;;  %v1534_v45 = vpop.f32.mrb[57].mxu1  ;;  %3758 = vmatprep.subr.bf16.mxu0 %v3757_v17 }
 0x735   :  { %v1535_v46 = vadd.f32 %v2371_v18, %v1534_v45  ;;  %3246 = vmatprep.mubr.f32.mxu0 %v1579_v41 }
 0x736   :  { %v1582_v47 = vmax.f32 %v1540_v44, 0.0  ;;  %3247 = vmatmul.mubr.f32.gmra.mrb[70].mxu0 %v1580_v43 }
 0x737   :  { %v1581_v48 = vmax.f32 %v1535_v46, 0.0  ;;  %v3198_v49 = vpop.f32.mrb[58].mxu1  ;;  %3760 = vmatpush3.bf16.msra.mxu0 %v3757_v17  ;;  %v2143_v17 = vld [vmem:[#allocation4 + $0x118] sm:$0xff] }
 0x738   :  { %v1550_v50 = vadd.f32 %v3198_v49, %v2371_v18  ;;  %v1544_v51 = vpop.f32.mrb[59].mxu1 }
 0x739   :  { %v1545_v52 = vadd.f32 %v2371_v18, %v1544_v51  ;;  %3249 = vmatprep.mubr.f32.mxu0 %v1581_v48 }
 0x73a   :  { %v1584_v53 = vmax.f32 %v1550_v50, 0.0  ;;  %3250 = vmatmul.mubr.f32.gmra.mrb[72].mxu0 %v1582_v47 }
 0x73b   :  { %v1583_v54 = vmax.f32 %v1545_v52, 0.0  ;;  %v3201_v55 = vpop.f32.mrb[60].mxu1 }
 0x73c   :  { %v1560_v56 = vadd.f32 %v3201_v55, %v2371_v18  ;;  %v1554_v57 = vpop.f32.mrb[61].mxu1 }
 0x73d   :  { %v1555_v58 = vadd.f32 %v2371_v18, %v1554_v57  ;;  %3252 = vmatprep.mubr.f32.mxu0 %v1583_v54 }
 0x73e   :  { %v1586_v59 = vmax.f32 %v1560_v56, 0.0  ;;  %3253 = vmatmul.mubr.f32.gmra.mrb[74].mxu0 %v1584_v53 }
 0x73f   :  { %v1585_v60 = vmax.f32 %v1555_v58, 0.0  ;;  %v3204_v61 = vpop.f32.mrb[62].mxu1 }
 0x740   :  { %v1570_v62 = vadd.f32 %v3204_v61, %v2371_v18  ;;  %v1564_v63 = vpop.f32.mrb[63].mxu1 }
 0x741   :  { %3255 = vmatprep.mubr.f32.mxu0 %v1585_v60  ;;  %v1565_v0 = vadd.f32 %v2371_v18, %v1564_v63  ;;  %v1965_v18 = vld [vmem:[#allocation4 + $0x350] sm:$0xff] }
 0x742   :  { %3256 = vmatmul.mubr.f32.gmra.mrb[76].mxu0 %v1586_v59  ;;  %v1588_v1 = vmax.f32 %v1570_v62, 0.0  ;;  %v3761_v20 = vpack.c.bf16 %v1966_v19, %v1965_v18  ;;  %v3777_v18 = vpack.c.bf16 %v2142_v16, %v2141_v15  ;;  %v2144_v19 = vld [vmem:[#allocation4 + $0x178] sm:$0xff] }
 0x743   :  { %v1587_v2 = vmax.f32 %v1565_v0, 0.0 }
 0x744   :  { %3762 = vmatprep.subr.bf16.mxu0 %v3761_v20  ;;  %3778 = vmatprep.subr.bf16.mxu1 %v3777_v18 }
 0x745   :  { %3258 = vmatprep.mubr.f32.mxu0 %v1587_v2  ;;  %3764 = vmatpush3.bf16.msra.mxu0 %v3761_v20  ;;  %v3781_v20 = vpack.c.bf16 %v2144_v19, %v2143_v17 }
 0x746   :  { %3259 = vmatmul.mubr.f32.gmra.mrb[78].mxu0 %v1588_v1  ;;  %3766 = vmatprep.subr.bf16.mxu0 %v3765_v23 }
 0x749   :  { %3768 = vmatpush3.bf16.msra.mxu0 %v3765_v23  ;;  %v3785_v23 = vpack.c.bf16 %v2146_v22, %v2145_v21  ;;  %v2155_v21 = vld [vmem:[#allocation4 + $0x598] sm:$0xff] }
 0x74a   :  { %3770 = vmatprep.subr.bf16.mxu0 %v3769_v26  ;;  %v2156_v22 = vld [vmem:[#allocation4 + $0x5f8] sm:$0xff] }
 0x74d   :  { %3772 = vmatpush3.bf16.msra.mxu0 %v3769_v26  ;;  %v3789_v26 = vpack.c.bf16 %v2148_v25, %v2147_v24  ;;  %v2374_v24 = vld [vmem:[#allocation6 + $0xa] ss:$0 sm:$0xff] }
 0x74e   :  { %3774 = vmatprep.subr.bf16.mxu0 %v3773_v14 }
 0x751   :  { %3776 = vmatpush3.bf16.msra.mxu0 %v3773_v14 }
 0x7fd   :  { %v3239_v28 = vpop.f32.mrb[64].mxu0 }
 0x7fe   :  { %v1684_v29 = vadd.f32 %v3239_v28, %v2372_v27  ;;  %v1678_v30 = vpop.f32.mrb[65].mxu0  ;;  %v2150_v28 = vld [vmem:[#allocation4 + $0x3b8] sm:$0xff] }
 0x7ff   :  { %v1679_v31 = vadd.f32 %v2372_v27, %v1678_v30  ;;  %v2151_v30 = vld [vmem:[#allocation4 + $0x418] sm:$0xff] }
 0x800   :  { %v1758_v34 = vmax.f32 %v1684_v29, 0.0 }
 0x801   :  { %v1757_v32 = vmax.f32 %v1679_v31, 0.0  ;;  %v3242_v33 = vpop.f32.mrb[66].mxu0  ;;  %v2152_v31 = vld [vmem:[#allocation4 + $0x478] sm:$0xff] }
 0x802   :  { %v1694_v35 = vadd.f32 %v3242_v33, %v2372_v27  ;;  %v1688_v36 = vpop.f32.mrb[67].mxu0  ;;  %v2153_v33 = vld [vmem:[#allocation4 + $0x4d8] sm:$0xff] }
 0x803   :  { %v1689_v37 = vadd.f32 %v2372_v27, %v1688_v36  ;;  %3293 = vmatprep.mubr.f32.mxu1 %v1757_v32  ;;  %v3797_v32 = vpack.c.bf16 %v2152_v31, %v2151_v30  ;;  %v2373_v36 = vld [vmem:[#allocation6 + $0x9] ss:$0 sm:$0xff] }
 0x804   :  { %3294 = vmatmul.mubr.f32.vlgmr.msra.gmra.mrb[64].mxu1 %v1758_v34  ;;  %v1760_v40 = vmax.f32 %v1694_v35, 0.0  ;;  %v2154_v34 = vld [vmem:[#allocation4 + $0x538] sm:$0xff] }
 0x805   :  { %v1759_v38 = vmax.f32 %v1689_v37, 0.0  ;;  %v3245_v39 = vpop.f32.mrb[68].mxu0  ;;  %3780 = vmatpush3.bf16.msra.mxu1 %v3777_v18  ;;  %v3801_v35 = vpack.c.bf16 %v2154_v34, %v2153_v33 }
 0x806   :  { %v1704_v41 = vadd.f32 %v3245_v39, %v2372_v27  ;;  %v1698_v42 = vpop.f32.mrb[69].mxu0  ;;  %3782 = vmatprep.subr.bf16.mxu1 %v3781_v20 }
 0x807   :  { %v1699_v43 = vadd.f32 %v2372_v27, %v1698_v42  ;;  %3296 = vmatprep.mubr.f32.mxu1 %v1759_v38 }
 0x808   :  { %3297 = vmatmul.mubr.f32.gmra.mrb[66].mxu1 %v1760_v40  ;;  %v1762_v46 = vmax.f32 %v1704_v41, 0.0 }
 0x809   :  { %v1761_v44 = vmax.f32 %v1699_v43, 0.0  ;;  %v3248_v45 = vpop.f32.mrb[70].mxu0  ;;  %3784 = vmatpush3.bf16.msra.mxu1 %v3781_v20 }
 0x80a   :  { %v1714_v47 = vadd.f32 %v3248_v45, %v2372_v27  ;;  %v1708_v48 = vpop.f32.mrb[71].mxu0  ;;  %3786 = vmatprep.subr.bf16.mxu1 %v3785_v23 }
 0x80b   :  { %v1709_v49 = vadd.f32 %v2372_v27, %v1708_v48  ;;  %3299 = vmatprep.mubr.f32.mxu1 %v1761_v44 }
 0x80c   :  { %3300 = vmatmul.mubr.f32.gmra.mrb[68].mxu1 %v1762_v46  ;;  %v1764_v52 = vmax.f32 %v1714_v47, 0.0 }
 0x80d   :  { %v1763_v50 = vmax.f32 %v1709_v49, 0.0  ;;  %v3251_v51 = vpop.f32.mrb[72].mxu0  ;;  %3788 = vmatpush3.bf16.msra.mxu1 %v3785_v23  ;;  %v3805_v23 = vpack.c.bf16 %v2156_v22, %v2155_v21 }
 0x80e   :  { %v1724_v53 = vadd.f32 %v3251_v51, %v2372_v27  ;;  %v1718_v54 = vpop.f32.mrb[73].mxu0  ;;  %3790 = vmatprep.subr.bf16.mxu1 %v3789_v26 }
 0x80f   :  { %v1719_v55 = vadd.f32 %v2372_v27, %v1718_v54  ;;  %3302 = vmatprep.mubr.f32.mxu1 %v1763_v50 }
 0x810   :  { %3303 = vmatmul.mubr.f32.gmra.mrb[70].mxu1 %v1764_v52  ;;  %v1766_v58 = vmax.f32 %v1724_v53, 0.0 }
 0x811   :  { %v1765_v56 = vmax.f32 %v1719_v55, 0.0  ;;  %v3254_v57 = vpop.f32.mrb[74].mxu0  ;;  %3792 = vmatpush3.bf16.msra.mxu1 %v3789_v26 }
 0x812   :  { %v1734_v59 = vadd.f32 %v3254_v57, %v2372_v27  ;;  %v1728_v60 = vpop.f32.mrb[75].mxu0 }
 0x813   :  { %v1729_v61 = vadd.f32 %v2372_v27, %v1728_v60  ;;  %3305 = vmatprep.mubr.f32.mxu1 %v1765_v56 }
 0x814   :  { %v1768_v62 = vmax.f32 %v1734_v59, 0.0  ;;  %3306 = vmatmul.mubr.f32.gmra.mrb[72].mxu1 %v1766_v58 }
 0x815   :  { %v1767_v63 = vmax.f32 %v1729_v61, 0.0  ;;  %v3257_v0 = vpop.f32.mrb[76].mxu0 }
 0x816   :  { %v1744_v1 = vadd.f32 %v3257_v0, %v2372_v27  ;;  %v1738_v2 = vpop.f32.mrb[77].mxu0 }
 0x817   :  { %v1739_v3 = vadd.f32 %v2372_v27, %v1738_v2  ;;  %3308 = vmatprep.mubr.f32.mxu1 %v1767_v63 }
 0x818   :  { %v1770_v4 = vmax.f32 %v1744_v1, 0.0  ;;  %3309 = vmatmul.mubr.f32.gmra.mrb[74].mxu1 %v1768_v62 }
 0x819   :  { %v1769_v5 = vmax.f32 %v1739_v3, 0.0  ;;  %v3260_v6 = vpop.f32.mrb[78].mxu0 }
 0x81a   :  { %v1754_v7 = vadd.f32 %v3260_v6, %v2372_v27  ;;  %v1748_v8 = vpop.f32.mrb[79].mxu0 }
 0x81b   :  { %3311 = vmatprep.mubr.f32.mxu1 %v1769_v5  ;;  %v1749_v9 = vadd.f32 %v2372_v27, %v1748_v8  ;;  %v2149_v27 = vld [vmem:[#allocation4 + $0x358] sm:$0xff] }
 0x81c   :  { %3312 = vmatmul.mubr.f32.gmra.mrb[76].mxu1 %v1770_v4  ;;  %v1772_v10 = vmax.f32 %v1754_v7, 0.0  ;;  %v3793_v29 = vpack.c.bf16 %v2150_v28, %v2149_v27 }
 0x81d   :  { %v1771_v11 = vmax.f32 %v1749_v9, 0.0 }
 0x81e   :  { %3794 = vmatprep.subr.bf16.mxu1 %v3793_v29 }
 0x81f   :  { %3314 = vmatprep.mubr.f32.mxu1 %v1771_v11  ;;  %3796 = vmatpush3.bf16.msra.mxu1 %v3793_v29 }
 0x820   :  { %3315 = vmatmul.mubr.f32.gmra.mrb[78].mxu1 %v1772_v10  ;;  %3798 = vmatprep.subr.bf16.mxu1 %v3797_v32 }
 0x823   :  { %3800 = vmatpush3.bf16.msra.mxu1 %v3797_v32 }
 0x824   :  { %3802 = vmatprep.subr.bf16.mxu1 %v3801_v35 }
 0x827   :  { %3804 = vmatpush3.bf16.msra.mxu1 %v3801_v35 }
 0x828   :  { %3806 = vmatprep.subr.bf16.mxu1 %v3805_v23 }
 0x82b   :  { %3808 = vmatpush3.bf16.msra.mxu1 %v3805_v23 }
 0x8d7   :  { %v3295_v37 = vpop.f32.mrb[64].mxu1 }
 0x8d8   :  { %v1868_v38 = vadd.f32 %v3295_v37, %v2373_v36  ;;  %v1862_v39 = vpop.f32.mrb[65].mxu1 }
 0x8d9   :  { %v1863_v40 = vadd.f32 %v2373_v36, %v1862_v39 }
 0x8da   :  { %v1942_v43 = vmax.f32 %v1868_v38, 0.0 }
 0x8db   :  { %v1941_v41 = vmax.f32 %v1863_v40, 0.0  ;;  %v3298_v42 = vpop.f32.mrb[66].mxu1 }
 0x8dc   :  { %v1878_v44 = vadd.f32 %v3298_v42, %v2373_v36  ;;  %v1872_v45 = vpop.f32.mrb[67].mxu1 }
 0x8dd   :  { %v1873_v46 = vadd.f32 %v2373_v36, %v1872_v45  ;;  %3349 = vmatprep.mubr.f32.mxu0 %v1941_v41 }
 0x8de   :  { %3350 = vmatmul.mubr.f32.vlgmr.msra.gmra.mrb[80].mxu0 %v1942_v43  ;;  %v1944_v49 = vmax.f32 %v1878_v44, 0.0 }
 0x8df   :  { %v1943_v47 = vmax.f32 %v1873_v46, 0.0  ;;  %v3301_v48 = vpop.f32.mrb[68].mxu1 }
 0x8e0   :  { %v1888_v50 = vadd.f32 %v3301_v48, %v2373_v36  ;;  %v1882_v51 = vpop.f32.mrb[69].mxu1 }
 0x8e1   :  { %v1883_v52 = vadd.f32 %v2373_v36, %v1882_v51  ;;  %3352 = vmatprep.mubr.f32.mxu0 %v1943_v47 }
 0x8e2   :  { %3353 = vmatmul.mubr.f32.gmra.mrb[82].mxu0 %v1944_v49  ;;  %v1946_v55 = vmax.f32 %v1888_v50, 0.0 }
 0x8e3   :  { %v1945_v53 = vmax.f32 %v1883_v52, 0.0  ;;  %v3304_v54 = vpop.f32.mrb[70].mxu1 }
 0x8e4   :  { %v1898_v56 = vadd.f32 %v3304_v54, %v2373_v36  ;;  %v1892_v57 = vpop.f32.mrb[71].mxu1 }
 0x8e5   :  { %v1893_v58 = vadd.f32 %v2373_v36, %v1892_v57  ;;  %3355 = vmatprep.mubr.f32.mxu0 %v1945_v53 }
 0x8e6   :  { %3356 = vmatmul.mubr.f32.gmra.mrb[84].mxu0 %v1946_v55  ;;  %v1948_v61 = vmax.f32 %v1898_v56, 0.0 }
 0x8e7   :  { %v1947_v59 = vmax.f32 %v1893_v58, 0.0  ;;  %v3307_v60 = vpop.f32.mrb[72].mxu1 }
 0x8e8   :  { %v1908_v62 = vadd.f32 %v3307_v60, %v2373_v36  ;;  %v1902_v63 = vpop.f32.mrb[73].mxu1 }
 0x8e9   :  { %v1903_v0 = vadd.f32 %v2373_v36, %v1902_v63  ;;  %3358 = vmatprep.mubr.f32.mxu0 %v1947_v59 }
 0x8ea   :  { %3359 = vmatmul.mubr.f32.gmra.mrb[86].mxu0 %v1948_v61  ;;  %v1950_v3 = vmax.f32 %v1908_v62, 0.0 }
 0x8eb   :  { %v1949_v1 = vmax.f32 %v1903_v0, 0.0  ;;  %v3310_v2 = vpop.f32.mrb[74].mxu1 }
 0x8ec   :  { %v1918_v4 = vadd.f32 %v3310_v2, %v2373_v36  ;;  %v1912_v5 = vpop.f32.mrb[75].mxu1 }
 0x8ed   :  { %v1913_v6 = vadd.f32 %v2373_v36, %v1912_v5  ;;  %3361 = vmatprep.mubr.f32.mxu0 %v1949_v1 }
 0x8ee   :  { %v1952_v7 = vmax.f32 %v1918_v4, 0.0  ;;  %3362 = vmatmul.mubr.f32.gmra.mrb[88].mxu0 %v1950_v3 }
 0x8ef   :  { %v1951_v8 = vmax.f32 %v1913_v6, 0.0  ;;  %v3313_v9 = vpop.f32.mrb[76].mxu1 }
 0x8f0   :  { %v1928_v10 = vadd.f32 %v3313_v9, %v2373_v36  ;;  %v1922_v11 = vpop.f32.mrb[77].mxu1  ;;  %v2375_v9 = vld [vmem:[#allocation6 + $0xb] ss:$0 sm:$0xff] }
 0x8f1   :  { %v1923_v12 = vadd.f32 %v2373_v36, %v1922_v11  ;;  %3364 = vmatprep.mubr.f32.mxu0 %v1951_v8 }
 0x8f2   :  { %v1954_v13 = vmax.f32 %v1928_v10, 0.0  ;;  %3365 = vmatmul.mubr.f32.gmra.mrb[90].mxu0 %v1952_v7 }
 0x8f3   :  { %v1953_v14 = vmax.f32 %v1923_v12, 0.0  ;;  %v3316_v15 = vpop.f32.mrb[78].mxu1 }
 0x8f4   :  { %v1938_v16 = vadd.f32 %v3316_v15, %v2373_v36  ;;  %v1932_v17 = vpop.f32.mrb[79].mxu1 }
 0x8f5   :  { %3367 = vmatprep.mubr.f32.mxu0 %v1953_v14  ;;  %v1933_v18 = vadd.f32 %v2373_v36, %v1932_v17 }
 0x8f6   :  { %3368 = vmatmul.mubr.f32.gmra.mrb[92].mxu0 %v1954_v13  ;;  %v1956_v19 = vmax.f32 %v1938_v16, 0.0 }
 0x8f7   :  { %v1955_v20 = vmax.f32 %v1933_v18, 0.0 }
 0x8f9   :  { %3370 = vmatprep.mubr.f32.mxu0 %v1955_v20 }
 0x8fa   :  { %3371 = vmatmul.mubr.f32.gmra.mrb[94].mxu0 %v1956_v19 }
 0x9b1   :  { %v3351_v25 = vpop.f32.mrb[80].mxu0 }
 0x9b2   :  { %v2052_v26 = vadd.f32 %v3351_v25, %v2374_v24  ;;  %v2046_v27 = vpop.f32.mrb[81].mxu0 }
 0x9b3   :  { %v2047_v28 = vadd.f32 %v2374_v24, %v2046_v27 }
 0x9b4   :  { %v2126_v31 = vmax.f32 %v2052_v26, 0.0 }
 0x9b5   :  { %v2125_v29 = vmax.f32 %v2047_v28, 0.0  ;;  %v3354_v30 = vpop.f32.mrb[82].mxu0 }
 0x9b6   :  { %v2062_v32 = vadd.f32 %v3354_v30, %v2374_v24  ;;  %v2056_v33 = vpop.f32.mrb[83].mxu0 }
 0x9b7   :  { %v2057_v34 = vadd.f32 %v2374_v24, %v2056_v33  ;;  %3405 = vmatprep.mubr.f32.mxu1 %v2125_v29 }
 0x9b8   :  { %3406 = vmatmul.mubr.f32.vlgmr.msra.gmra.mrb[80].mxu1 %v2126_v31  ;;  %v2128_v37 = vmax.f32 %v2062_v32, 0.0 }
 0x9b9   :  { %v2127_v35 = vmax.f32 %v2057_v34, 0.0  ;;  %v3357_v36 = vpop.f32.mrb[84].mxu0 }
 0x9ba   :  { %v2072_v38 = vadd.f32 %v3357_v36, %v2374_v24  ;;  %v2066_v39 = vpop.f32.mrb[85].mxu0 }
 0x9bb   :  { %v2067_v40 = vadd.f32 %v2374_v24, %v2066_v39  ;;  %3408 = vmatprep.mubr.f32.mxu1 %v2127_v35 }
 0x9bc   :  { %3409 = vmatmul.mubr.f32.gmra.mrb[82].mxu1 %v2128_v37  ;;  %v2130_v43 = vmax.f32 %v2072_v38, 0.0 }
 0x9bd   :  { %v2129_v41 = vmax.f32 %v2067_v40, 0.0  ;;  %v3360_v42 = vpop.f32.mrb[86].mxu0 }
 0x9be   :  { %v2082_v44 = vadd.f32 %v3360_v42, %v2374_v24  ;;  %v2076_v45 = vpop.f32.mrb[87].mxu0 }
 0x9bf   :  { %v2077_v46 = vadd.f32 %v2374_v24, %v2076_v45  ;;  %3411 = vmatprep.mubr.f32.mxu1 %v2129_v41 }
 0x9c0   :  { %3412 = vmatmul.mubr.f32.gmra.mrb[84].mxu1 %v2130_v43  ;;  %v2132_v49 = vmax.f32 %v2082_v44, 0.0 }
 0x9c1   :  { %v2131_v47 = vmax.f32 %v2077_v46, 0.0  ;;  %v3363_v48 = vpop.f32.mrb[88].mxu0 }
 0x9c2   :  { %v2092_v50 = vadd.f32 %v3363_v48, %v2374_v24  ;;  %v2086_v51 = vpop.f32.mrb[89].mxu0 }
 0x9c3   :  { %v2087_v52 = vadd.f32 %v2374_v24, %v2086_v51  ;;  %3414 = vmatprep.mubr.f32.mxu1 %v2131_v47 }
 0x9c4   :  { %3415 = vmatmul.mubr.f32.gmra.mrb[86].mxu1 %v2132_v49  ;;  %v2134_v55 = vmax.f32 %v2092_v50, 0.0 }
 0x9c5   :  { %v2133_v53 = vmax.f32 %v2087_v52, 0.0  ;;  %v3366_v54 = vpop.f32.mrb[90].mxu0 }
 0x9c6   :  { %v2102_v56 = vadd.f32 %v3366_v54, %v2374_v24  ;;  %v2096_v57 = vpop.f32.mrb[91].mxu0 }
 0x9c7   :  { %v2097_v58 = vadd.f32 %v2374_v24, %v2096_v57  ;;  %3417 = vmatprep.mubr.f32.mxu1 %v2133_v53 }
 0x9c8   :  { %3418 = vmatmul.mubr.f32.gmra.mrb[88].mxu1 %v2134_v55  ;;  %v2136_v61 = vmax.f32 %v2102_v56, 0.0 }
 0x9c9   :  { %v2135_v59 = vmax.f32 %v2097_v58, 0.0  ;;  %v3369_v60 = vpop.f32.mrb[92].mxu0 }
 0x9ca   :  { %v2112_v62 = vadd.f32 %v3369_v60, %v2374_v24  ;;  %v2106_v63 = vpop.f32.mrb[93].mxu0 }
 0x9cb   :  { %v2107_v0 = vadd.f32 %v2374_v24, %v2106_v63  ;;  %3420 = vmatprep.mubr.f32.mxu1 %v2135_v59 }
 0x9cc   :  { %v2138_v1 = vmax.f32 %v2112_v62, 0.0  ;;  %3421 = vmatmul.mubr.f32.gmra.mrb[90].mxu1 %v2136_v61 }
 0x9cd   :  { %v2137_v2 = vmax.f32 %v2107_v0, 0.0  ;;  %v3372_v3 = vpop.f32.mrb[94].mxu0 }
 0x9ce   :  { %v2122_v4 = vadd.f32 %v3372_v3, %v2374_v24  ;;  %v2116_v5 = vpop.f32.mrb[95].mxu0 }
 0x9cf   :  { %3423 = vmatprep.mubr.f32.mxu1 %v2137_v2  ;;  %v2117_v6 = vadd.f32 %v2374_v24, %v2116_v5 }
 0x9d0   :  { %3424 = vmatmul.mubr.f32.gmra.mrb[92].mxu1 %v2138_v1  ;;  %v2140_v7 = vmax.f32 %v2122_v4, 0.0 }
 0x9d1   :  { %v2139_v8 = vmax.f32 %v2117_v6, 0.0 }
 0x9d3   :  { %3426 = vmatprep.mubr.f32.mxu1 %v2139_v8 }
 0x9d4   :  { %3427 = vmatmul.mubr.f32.gmra.mrb[94].mxu1 %v2140_v7 }
 0xa8b   :  { %v3407_v10 = vpop.f32.mrb[80].mxu1 }
 0xa8c   :  { %v2230_v11 = vpop.f32.mrb[81].mxu1  ;;  %v2236_v15 = vadd.f32 %v3407_v10, %v2375_v9 }
 0xa8d   :  { %v2231_v12 = vadd.f32 %v2375_v9, %v2230_v11 }
 0xa8f   :  { %v3410_v13 = vpop.f32.mrb[82].mxu1  ;;  %2309 = vxpose.xlu0.b32.start [1/16] (narrow) %v2231_v12, 8 }
 0xa90   :  { %v2240_v14 = vpop.f32.mrb[83].mxu1  ;;  %v2246_v21 = vadd.f32 %v3410_v13, %v2375_v9 }
 0xa91   :  { %v2241_v18 = vadd.f32 %v2375_v9, %v2240_v14 }
 0xa93   :  { %v3413_v16 = vpop.f32.mrb[84].mxu1  ;;  %2310 = vxpose.xlu0.b32.cont [2/16] (narrow) %v2236_v15, 8 }
 0xa94   :  { %v2250_v17 = vpop.f32.mrb[85].mxu1  ;;  %v2256_v27 = vadd.f32 %v3413_v16, %v2375_v9 }
 0xa95   :  { %v2251_v24 = vadd.f32 %v2375_v9, %v2250_v17 }
 0xa97   :  { %v3416_v19 = vpop.f32.mrb[86].mxu1  ;;  %2311 = vxpose.xlu0.b32.cont [3/16] (narrow) %v2241_v18, 8 }
 0xa98   :  { %v2260_v20 = vpop.f32.mrb[87].mxu1  ;;  %v2266_v33 = vadd.f32 %v3416_v19, %v2375_v9 }
 0xa99   :  { %v2261_v30 = vadd.f32 %v2375_v9, %v2260_v20 }
 0xa9b   :  { %v3419_v22 = vpop.f32.mrb[88].mxu1  ;;  %2312 = vxpose.xlu0.b32.cont [4/16] (narrow) %v2246_v21, 8 }
 0xa9c   :  { %v2270_v23 = vpop.f32.mrb[89].mxu1  ;;  %v2276_v35 = vadd.f32 %v3419_v22, %v2375_v9 }
 0xa9d   :  { %v2271_v34 = vadd.f32 %v2375_v9, %v2270_v23 }
 0xa9f   :  { %v3422_v25 = vpop.f32.mrb[90].mxu1  ;;  %2313 = vxpose.xlu0.b32.cont [5/16] (narrow) %v2251_v24, 8 }
 0xaa0   :  { %v2280_v26 = vpop.f32.mrb[91].mxu1  ;;  %v2286_v37 = vadd.f32 %v3422_v25, %v2375_v9 }
 0xaa1   :  { %v2281_v36 = vadd.f32 %v2375_v9, %v2280_v26 }
 0xaa3   :  { %2314 = vxpose.xlu0.b32.cont [6/16] (narrow) %v2256_v27, 8  ;;  %v3425_v28 = vpop.f32.mrb[92].mxu1 }
 0xaa4   :  { %v2290_v29 = vpop.f32.mrb[93].mxu1  ;;  %v2296_v39 = vadd.f32 %v3425_v28, %v2375_v9 }
 0xaa5   :  { %v2291_v38 = vadd.f32 %v2375_v9, %v2290_v29 }
 0xaa7   :  { %2315 = vxpose.xlu0.b32.cont [7/16] (narrow) %v2261_v30, 8  ;;  %v3428_v31 = vpop.f32.mrb[94].mxu1 }
 0xaa8   :  { %v2300_v32 = vpop.f32.mrb[95].mxu1  ;;  %v2306_v41 = vadd.f32 %v3428_v31, %v2375_v9 }
 0xaa9   :  { %v2301_v40 = vadd.f32 %v2375_v9, %v2300_v32 }
 0xaab   :  { %2316 = vxpose.xlu0.b32.cont [8/16] (narrow) %v2266_v33, 8 }
 0xaaf   :  { %2317 = vxpose.xlu0.b32.cont [9/16] (narrow) %v2271_v34, 8 }
 0xab3   :  { %2318 = vxpose.xlu0.b32.cont [10/16] (narrow) %v2276_v35, 8 }
 0xab7   :  { %2319 = vxpose.xlu0.b32.cont [11/16] (narrow) %v2281_v36, 8 }
 0xabb   :  { %2320 = vxpose.xlu0.b32.cont [12/16] (narrow) %v2286_v37, 8 }
 0xabf   :  { %2321 = vxpose.xlu0.b32.cont [13/16] (narrow) %v2291_v38, 8 }
 0xac3   :  { %2322 = vxpose.xlu0.b32.cont [14/16] (narrow) %v2296_v39, 8 }
 0xac7   :  { %2323 = vxpose.xlu0.b32.cont [15/16] (narrow) %v2301_v40, 8 }
 0xacb   :  { %2324 = vxpose.xlu0.b32.end [16/16] (narrow) %v2306_v41, 8 }
 0xb0f   :  { %v2325_v42 = vpop.trf.xlu0 }
 0xb10   :  { %2341 = vst [vmem:[%s3971_s3] sm:$0x1] %v2325_v42 }
 0xb11   :  { %2346 = vsyncpa [#allocation3], 1 }
 0xb12   :  { %2347 = vsyncpa [#allocation5], 1 }

</bundles_post_ra>
